<compile_context>
chip_gen: v6e
topology: v6e:2x2x1
jax: 0.10.0
libtpu: 0.0.40
codegen_flags: <defaults>
</compile_context>

<pallas_src>
import functools
import math

import jax
import jax.numpy as jnp
from jax.experimental import pallas as pl
from jax.experimental.pallas import tpu as pltpu


def _attention_kernel(q_ref, k_ref, v_ref, *rest, n_heads, head_size, has_mask,
                      approx_recip):
    if has_mask:
        (mask_ref, wqkv_ref, bqkv_ref, wo_ref, bo_ref,
         o_ref, kcache, vcache) = rest
    else:
        (wqkv_ref, bqkv_ref, wo_ref, bo_ref,
         o_ref, kcache, vcache) = rest
        mask_ref = None

    f32 = jnp.float32
    bf16 = jnp.bfloat16
    H = n_heads * head_size
    tq = q_ref.shape[1]
    skv = k_ref.shape[1]

    # --- K/V projection + head split: once per batch row (query-tile 0 only),
    # cached in VMEM scratch as (n_heads, S_kv, head_size) bf16. ---
    @pl.when(pl.program_id(1) == 0)
    def _fill_kv_cache():
        k = k_ref[0]                                     # (skv, H) bf16
        v = v_ref[0]
        pk = jnp.dot(k, wqkv_ref[1], preferred_element_type=f32) + bqkv_ref[1]
        pv = jnp.dot(v, wqkv_ref[2], preferred_element_type=f32) + bqkv_ref[2]
        pk3 = pk.astype(bf16).reshape(skv, n_heads, head_size)
        pv3 = pv.astype(bf16).reshape(skv, n_heads, head_size)
        kcache[...] = jnp.swapaxes(pk3, 0, 1)            # (n, skv, hs)
        vcache[...] = jnp.swapaxes(pv3, 0, 1)            # (n, skv, hs)

    # --- Q projection for this tile (1/sqrt(hs) already folded into Wq/bq). ---
    q = q_ref[0]                                         # (tq, H) bf16
    pq = jnp.dot(q, wqkv_ref[0], preferred_element_type=f32) + bqkv_ref[0]
    pq3 = pq.astype(bf16).reshape(tq, n_heads, head_size)   # (tq, n, hs)

    # --- Head-batched scores (n, tq, skv) in f32. ---
    scores = jnp.einsum("qnd,nkd->nqk", pq3, kcache[...],
                        preferred_element_type=f32)

    if has_mask:
        # mask already holds 0 / -1e9 (additive), shipped as bf16.
        scores = scores + mask_ref[0, 0].astype(f32)[None, :, :]

    # --- Softmax in f32; approx reciprocal uses the (otherwise idle) EUP. ---
    m = jnp.max(scores, axis=-1, keepdims=True)
    p = jnp.exp(scores - m)
    denom = jnp.sum(p, axis=-1, keepdims=True)
    if approx_recip:
        p = p * pl.reciprocal(denom, approx=True)
    else:
        p = p / denom
    # attn_dropout: identity (eval mode)

    # --- Context, then ONE full-width output projection. ---
    ctx = jnp.einsum("nqk,nkd->nqd", p.astype(bf16), vcache[...],
                     preferred_element_type=f32)          # (n, tq, hs)
    ctx_flat = jnp.swapaxes(ctx.astype(bf16), 0, 1).reshape(tq, H)  # (tq, H)
    out = jnp.dot(ctx_flat, wo_ref[...], preferred_element_type=f32) + bo_ref[...]
    o_ref[0] = out.astype(o_ref.dtype)


def _default_vmem_limit_bytes():
    """~75% of this generation's physical VMEM (headroom for compiler scratch)."""
    try:
        info = pltpu.get_tpu_info()
        cap = None
        for name in ("vmem_capacity_bytes", "vmem_size_bytes", "vmem_bytes"):
            cap = getattr(info, name, None)
            if cap:
                break
        if not cap:
            raise ValueError("no vmem capacity field")
        return int(cap) * 3 // 4
    except Exception:
        return 48 * 1024 * 1024     # conservative fallback (safe on v7x too)


def _make_attention_call(*, B, S_q, S_kv, H, n_heads, head_size, tq, out_dtype,
                         has_mask, approx_recip, single_buffer_weights):
    n_qt = S_q // tq

    const_kwargs = {}
    if single_buffer_weights:
        # Grid-constant blocks never get re-fetched; single-buffer them.
        const_kwargs = dict(pipeline_mode=pl.Buffered(1))

    q_spec = pl.BlockSpec((1, tq, H), lambda b, i: (b, i, 0))
    kv_spec = pl.BlockSpec((1, S_kv, H), lambda b, i: (b, 0, 0))
    out_spec = pl.BlockSpec((1, tq, H), lambda b, i: (b, i, 0))
    wqkv_spec = pl.BlockSpec((3, H, H), lambda b, i: (0, 0, 0), **const_kwargs)
    bqkv_spec = pl.BlockSpec((3, 1, H), lambda b, i: (0, 0, 0), **const_kwargs)
    wo_spec = pl.BlockSpec((H, H), lambda b, i: (0, 0), **const_kwargs)
    bo_spec = pl.BlockSpec((1, H), lambda b, i: (0, 0), **const_kwargs)

    in_specs = [q_spec, kv_spec, kv_spec]
    if has_mask:
        in_specs.append(pl.BlockSpec((1, 1, tq, S_kv), lambda b, i: (b, 0, i, 0)))
    in_specs += [wqkv_spec, bqkv_spec, wo_spec, bo_spec]

    kernel = functools.partial(_attention_kernel, n_heads=n_heads,
                               head_size=head_size, has_mask=has_mask,
                               approx_recip=approx_recip)

    return pl.pallas_call(
        kernel,
        out_shape=jax.ShapeDtypeStruct((B, S_q, H), out_dtype),
        grid_spec=pltpu.PrefetchScalarGridSpec(
            num_scalar_prefetch=0,
            grid=(B, n_qt),
            in_specs=in_specs,
            out_specs=out_spec,
            scratch_shapes=[
                pltpu.VMEM((n_heads, S_kv, head_size), jnp.bfloat16),  # K cache
                pltpu.VMEM((n_heads, S_kv, head_size), jnp.bfloat16),  # V cache
            ]),
        compiler_params=pltpu.CompilerParams(
            # query-tile axis must be "arbitrary": the K/V cache is filled at
            # tile 0 and reused by the later tiles of the same batch row.
            dimension_semantics=("parallel", "arbitrary"),
            vmem_limit_bytes=_default_vmem_limit_bytes(),
        ),
    )


def presidential_attention(query, key, value, params, n_heads,
                           attention_mask=None, approx_softmax_reciprocal=True):
    """query: [B, Sq, H]; key/value: [B, Skv, H]; mask: [B, 1, Sq, Skv] or None."""
    B, S_q, H = query.shape
    S_kv = key.shape[1]
    head_size = H // n_heads
    assert n_heads * head_size == H

    # Largest query tile dividing S_q (amortizes ~0.35us/step; bigger is better
    # on v5e/v6e's 128 MiB VMEM).
    tq = S_q
    for cand in (512, 256, 128):
        if S_q % cand == 0:
            tq = cand
            break
    # TODO(synk): S_q not a multiple of 128 falls back to a single full tile;
    # long ragged sequences should be padded to a tile multiple instead.

    # bf16 activations/weights on the MXU (f32 accumulation in-kernel);
    # biases stay f32.  1/sqrt(head_size) folded into Wq/bq on the host.
    scale = 1.0 / math.sqrt(head_size)
    qb = query.astype(jnp.bfloat16)
    kb = key.astype(jnp.bfloat16)
    vb = value.astype(jnp.bfloat16)
    wqkv = jnp.stack([params["wq"] * scale, params["wk"], params["wv"]], axis=0
                     ).astype(jnp.bfloat16)                         # (3, H, H)
    bqkv = jnp.stack([params["bq"] * scale, params["bk"], params["bv"]], axis=0
                     ).astype(jnp.float32)                          # (3, 1, H)
    wo = params["wo"].astype(jnp.bfloat16)                          # (H, H)
    bo = params["bo"].astype(jnp.float32)                           # (1, H)

    has_mask = attention_mask is not None
    args = [qb, kb, vb]
    if has_mask:
        # Additive mask pre-scaled on host: 0 / -1e9 (binary 0/1 contract is
        # exact; the -1e9 value itself is approximated in bf16, which is fine
        # since it only has to underflow the softmax).
        mask_add = (attention_mask.astype(jnp.float32) * jnp.float32(-1e9)
                    ).astype(jnp.bfloat16)
        args.append(mask_add)
    args += [wqkv, bqkv, wo, bo]

    common = dict(B=B, S_q=S_q, S_kv=S_kv, H=H, n_heads=n_heads,
                  head_size=head_size, tq=tq, out_dtype=query.dtype,
                  has_mask=has_mask, approx_recip=approx_softmax_reciprocal)
    try:
        return _make_attention_call(single_buffer_weights=True, **common)(*args)
    except Exception:
        # pipeline_mode=pl.Buffered(1) unsupported on this Pallas build ->
        # fall back to default (double) buffering of the constant weights.
        return _make_attention_call(single_buffer_weights=False, **common)(*args)


def init_params(key, hidden_size):
    """Deterministic synthetic parameters; weights stored as [in, out]."""
    ks = jax.random.split(key, 8)
    std = 1.0 / math.sqrt(hidden_size)
    def w(k):
        return jax.random.uniform(k, (hidden_size, hidden_size),
                                  jnp.float32, -std, std)
    def b(k):
        return jax.random.uniform(k, (1, hidden_size), jnp.float32, -std, std)
    return {
        "wq": w(ks[0]), "bq": b(ks[1]),
        "wk": w(ks[2]), "bk": b(ks[3]),
        "wv": w(ks[4]), "bv": b(ks[5]),
        "wo": w(ks[6]), "bo": b(ks[7]),
    }


def reference_attention(query, key, value, params, n_heads, attention_mask=None):
    """Pure-JAX f32 reference mirroring the PyTorch forward (dropout = identity)."""
    B, S, H = query.shape
    hs = H // n_heads
    def proj(x, w, b):
        return x @ w + b
    pq = proj(query, params["wq"], params["bq"]).reshape(B, S, n_heads, hs).transpose(0, 2, 1, 3)
    pk = proj(key, params["wk"], params["bk"]).reshape(B, key.shape[1], n_heads, hs).transpose(0, 2, 1, 3)
    pv = proj(value, params["wv"], params["bv"]).reshape(B, value.shape[1], n_heads, hs).transpose(0, 2, 1, 3)
    scores = jnp.einsum("bhqd,bhkd->bhqk", pq, pk) / math.sqrt(hs)
    if attention_mask is not None:
        scores = scores + attention_mask * (-1e9)
    attn = jax.nn.softmax(scores, axis=-1)
    out = jnp.einsum("bhqk,bhkd->bhqd", attn, pv).transpose(0, 2, 1, 3).reshape(B, S, H)
    return out @ params["wo"] + params["bo"]


if __name__ == "__main__":
    B, S, H, NH = 2, 8, 32, 4

    root = jax.random.PRNGKey(0)
    k_q, k_k, k_v, k_m, k_p = jax.random.split(root, 5)

    query = jax.random.normal(k_q, (B, S, H), jnp.float32)
    key_ = jax.random.normal(k_k, (B, S, H), jnp.float32)
    value = jax.random.normal(k_v, (B, S, H), jnp.float32)
    # binary mask: 1 = masked position, 0 = keep
    attention_mask = (jax.random.uniform(k_m, (B, 1, S, S)) > 0.8).astype(jnp.float32)

    params = init_params(k_p, H)

    # Masked path.
    out = jax.block_until_ready(
        presidential_attention(query, key_, value, params, NH, attention_mask))
    ref = reference_attention(query, key_, value, params, NH, attention_mask)
    assert out.shape == (B, S, H)
    # bf16 MXU inputs vs f32 reference -> loose-but-meaningful tolerance.
    assert jnp.allclose(out, ref, atol=5e-2, rtol=5e-2), "masked-path mismatch"

    # Unmasked path (no dense zero mask is materialised or DMA'd).
    out_nm = jax.block_until_ready(
        presidential_attention(query, key_, value, params, NH, None))
    ref_nm = reference_attention(query, key_, value, params, NH, None)
    assert jnp.allclose(out_nm, ref_nm, atol=5e-2, rtol=5e-2), "unmasked-path mismatch"

    print("KERNEL_OK")
</pallas_src>

<mosaic_0001>
module attributes {stable_mosaic.version = 11 : i64} {
  func.func @_attention_kernel(%arg0: i32, %arg1: i32, %arg2: memref<1x8x32xbf16, #tpu.memory_space<vmem>>, %arg3: memref<1x8x32xbf16, #tpu.memory_space<vmem>>, %arg4: memref<1x8x32xbf16, #tpu.memory_space<vmem>>, %arg5: memref<1x1x8x8xbf16, #tpu.memory_space<vmem>>, %arg6: memref<3x32x32xbf16, #tpu.memory_space<vmem>>, %arg7: memref<3x1x32xf32, #tpu.memory_space<vmem>>, %arg8: memref<32x32xbf16, #tpu.memory_space<vmem>>, %arg9: memref<1x32xf32, #tpu.memory_space<vmem>>, %arg10: memref<1x8x32xf32, #tpu.memory_space<vmem>>, %arg11: memref<4x8x8xbf16, #tpu.memory_space<vmem>>, %arg12: memref<4x8x8xbf16, #tpu.memory_space<vmem>>) attributes {dimension_semantics = [#tpu.dimension_semantics<parallel>, #tpu.dimension_semantics<arbitrary>], iteration_bounds = array<i64: 2, 1>, scalar_prefetch = 0 : i64, scratch_operands = 2 : i64, tpu.core_type = #tpu.core_type<tc>, window_params = [{transform_indices = @transform_0, window_bounds = array<i64: 1, 8, 32>}, {transform_indices = @transform_1, window_bounds = array<i64: 1, 8, 32>}, {transform_indices = @transform_2, window_bounds = array<i64: 1, 8, 32>}, {transform_indices = @transform_3, window_bounds = array<i64: 1, 1, 8, 8>}, {pipeline_mode = #tpu.pipeline_mode<synchronous>, transform_indices = @transform_4, window_bounds = array<i64: 3, 32, 32>}, {pipeline_mode = #tpu.pipeline_mode<synchronous>, transform_indices = @transform_5, window_bounds = array<i64: 3, 1, 32>}, {pipeline_mode = #tpu.pipeline_mode<synchronous>, transform_indices = @transform_6, window_bounds = array<i64: 32, 32>}, {pipeline_mode = #tpu.pipeline_mode<synchronous>, transform_indices = @transform_7, window_bounds = array<i64: 1, 32>}, {transform_indices = @transform_8, window_bounds = array<i64: 1, 8, 32>}]} {
    %c0_i32 = arith.constant 0 : i32
    %0 = arith.cmpi eq, %arg1, %c0_i32 : i32
    %1 = arith.extui %0 : i1 to i32
    %c0_i32_0 = arith.constant 0 : i32
    %2 = arith.cmpi ne, %1, %c0_i32_0 : i32
    scf.if %2 {
      %c0_31 = arith.constant 0 : index
      %c0_32 = arith.constant 0 : index
      %c0_33 = arith.constant 0 : index
      %46 = vector.load %arg3[%c0_31, %c0_32, %c0_33] : memref<1x8x32xbf16, #tpu.memory_space<vmem>>, vector<1x8x32xbf16>
      %47 = vector.shape_cast %46 : vector<1x8x32xbf16> to vector<8x32xbf16>
      %c0_34 = arith.constant 0 : index
      %c0_35 = arith.constant 0 : index
      %c0_36 = arith.constant 0 : index
      %48 = vector.load %arg4[%c0_34, %c0_35, %c0_36] : memref<1x8x32xbf16, #tpu.memory_space<vmem>>, vector<1x8x32xbf16>
      %49 = vector.shape_cast %48 : vector<1x8x32xbf16> to vector<8x32xbf16>
      %c1 = arith.constant 1 : index
      %c0_37 = arith.constant 0 : index
      %c0_38 = arith.constant 0 : index
      %50 = vector.load %arg6[%c1, %c0_37, %c0_38] : memref<3x32x32xbf16, #tpu.memory_space<vmem>>, vector<1x32x32xbf16>
      %51 = vector.shape_cast %50 : vector<1x32x32xbf16> to vector<32x32xbf16>
      %cst_39 = arith.constant dense<0.000000e+00> : vector<8x32xf32>
      %52 = tpu.matmul %47, %51, %cst_39 {dimension_numbers = #tpu.dot_dimension_numbers<[1], [0], [0], [1], [0, 0, 1, 1], [], []>} : vector<8x32xbf16>, vector<32x32xbf16>, vector<8x32xf32> -> vector<8x32xf32>
      %c1_40 = arith.constant 1 : index
      %c0_41 = arith.constant 0 : index
      %c0_42 = arith.constant 0 : index
      %53 = vector.load %arg7[%c1_40, %c0_41, %c0_42] : memref<3x1x32xf32, #tpu.memory_space<vmem>>, vector<1x1x32xf32>
      %54 = vector.shape_cast %53 : vector<1x1x32xf32> to vector<1x32xf32>
      %55 = vector.broadcast %54 : vector<1x32xf32> to vector<8x32xf32>
      %56 = arith.addf %52, %55 : vector<8x32xf32>
      %c2 = arith.constant 2 : index
      %c0_43 = arith.constant 0 : index
      %c0_44 = arith.constant 0 : index
      %57 = vector.load %arg6[%c2, %c0_43, %c0_44] : memref<3x32x32xbf16, #tpu.memory_space<vmem>>, vector<1x32x32xbf16>
      %58 = vector.shape_cast %57 : vector<1x32x32xbf16> to vector<32x32xbf16>
      %cst_45 = arith.constant dense<0.000000e+00> : vector<8x32xf32>
      %59 = tpu.matmul %49, %58, %cst_45 {dimension_numbers = #tpu.dot_dimension_numbers<[1], [0], [0], [1], [0, 0, 1, 1], [], []>} : vector<8x32xbf16>, vector<32x32xbf16>, vector<8x32xf32> -> vector<8x32xf32>
      %c2_46 = arith.constant 2 : index
      %c0_47 = arith.constant 0 : index
      %c0_48 = arith.constant 0 : index
      %60 = vector.load %arg7[%c2_46, %c0_47, %c0_48] : memref<3x1x32xf32, #tpu.memory_space<vmem>>, vector<1x1x32xf32>
      %61 = vector.shape_cast %60 : vector<1x1x32xf32> to vector<1x32xf32>
      %62 = vector.broadcast %61 : vector<1x32xf32> to vector<8x32xf32>
      %63 = arith.addf %59, %62 : vector<8x32xf32>
      %64 = arith.truncf %56 : vector<8x32xf32> to vector<8x32xbf16>
      %65 = vector.shape_cast %64 : vector<8x32xbf16> to vector<8x4x8xbf16>
      %66 = arith.truncf %63 : vector<8x32xf32> to vector<8x32xbf16>
      %67 = vector.shape_cast %66 : vector<8x32xbf16> to vector<8x4x8xbf16>
      %68 = tpu.transpose %65, [1, 0, 2] : vector<8x4x8xbf16> -> vector<4x8x8xbf16>
      %c0_49 = arith.constant 0 : index
      %c0_50 = arith.constant 0 : index
      %c0_51 = arith.constant 0 : index
      %69 = vector.load %arg11[%c0_49, %c0_50, %c0_51] : memref<4x8x8xbf16, #tpu.memory_space<vmem>>, vector<4x8x8xbf16>
      tpu.vector_store %arg11[%c0_49, %c0_50, %c0_51], %68 {strides = array<i32>} : memref<4x8x8xbf16, #tpu.memory_space<vmem>>, vector<4x8x8xbf16>,
      %70 = tpu.transpose %67, [1, 0, 2] : vector<8x4x8xbf16> -> vector<4x8x8xbf16>
      %c0_52 = arith.constant 0 : index
      %c0_53 = arith.constant 0 : index
      %c0_54 = arith.constant 0 : index
      %71 = vector.load %arg12[%c0_52, %c0_53, %c0_54] : memref<4x8x8xbf16, #tpu.memory_space<vmem>>, vector<4x8x8xbf16>
      tpu.vector_store %arg12[%c0_52, %c0_53, %c0_54], %70 {strides = array<i32>} : memref<4x8x8xbf16, #tpu.memory_space<vmem>>, vector<4x8x8xbf16>,
    } else {
    }
    %c0 = arith.constant 0 : index
    %c0_1 = arith.constant 0 : index
    %c0_2 = arith.constant 0 : index
    %3 = vector.load %arg2[%c0, %c0_1, %c0_2] : memref<1x8x32xbf16, #tpu.memory_space<vmem>>, vector<1x8x32xbf16>
    %4 = vector.shape_cast %3 : vector<1x8x32xbf16> to vector<8x32xbf16>
    %c0_3 = arith.constant 0 : index
    %c0_4 = arith.constant 0 : index
    %c0_5 = arith.constant 0 : index
    %5 = vector.load %arg6[%c0_3, %c0_4, %c0_5] : memref<3x32x32xbf16, #tpu.memory_space<vmem>>, vector<1x32x32xbf16>
    %6 = vector.shape_cast %5 : vector<1x32x32xbf16> to vector<32x32xbf16>
    %cst = arith.constant dense<0.000000e+00> : vector<8x32xf32>
    %7 = tpu.matmul %4, %6, %cst {dimension_numbers = #tpu.dot_dimension_numbers<[1], [0], [0], [1], [0, 0, 1, 1], [], []>} : vector<8x32xbf16>, vector<32x32xbf16>, vector<8x32xf32> -> vector<8x32xf32>
    %c0_6 = arith.constant 0 : index
    %c0_7 = arith.constant 0 : index
    %c0_8 = arith.constant 0 : index
    %8 = vector.load %arg7[%c0_6, %c0_7, %c0_8] : memref<3x1x32xf32, #tpu.memory_space<vmem>>, vector<1x1x32xf32>
    %9 = vector.shape_cast %8 : vector<1x1x32xf32> to vector<1x32xf32>
    %10 = vector.broadcast %9 : vector<1x32xf32> to vector<8x32xf32>
    %11 = arith.addf %7, %10 : vector<8x32xf32>
    %12 = arith.truncf %11 : vector<8x32xf32> to vector<8x32xbf16>
    %13 = vector.shape_cast %12 : vector<8x32xbf16> to vector<8x4x8xbf16>
    %c0_9 = arith.constant 0 : index
    %c0_10 = arith.constant 0 : index
    %c0_11 = arith.constant 0 : index
    %14 = vector.load %arg11[%c0_9, %c0_10, %c0_11] : memref<4x8x8xbf16, #tpu.memory_space<vmem>>, vector<4x8x8xbf16>
    "tpu.trace_start"() <{level = 10 : i32, message = "qnd,nkd->nqk"}> : () -> ()
    %cst_12 = arith.constant dense<0.000000e+00> : vector<4x8x8xf32>
    %15 = tpu.matmul %13, %14, %cst_12 {dimension_numbers = #tpu.dot_dimension_numbers<[2], [2], [0], [1], [0, 1, 0, 0, 1, 1], [1], [0]>} : vector<8x4x8xbf16>, vector<4x8x8xbf16>, vector<4x8x8xf32> -> vector<4x8x8xf32>
    "tpu.trace_stop"() : () -> ()
    %c0_13 = arith.constant 0 : index
    %c0_14 = arith.constant 0 : index
    %c0_15 = arith.constant 0 : index
    %c0_16 = arith.constant 0 : index
    %16 = vector.load %arg5[%c0_13, %c0_14, %c0_15, %c0_16] : memref<1x1x8x8xbf16, #tpu.memory_space<vmem>>, vector<1x1x8x8xbf16>
    %17 = vector.shape_cast %16 : vector<1x1x8x8xbf16> to vector<8x8xbf16>
    %18 = arith.extf %17 : vector<8x8xbf16> to vector<8x8xf32>
    %19 = vector.shape_cast %18 : vector<8x8xf32> to vector<1x8x8xf32>
    %20 = vector.broadcast %19 : vector<1x8x8xf32> to vector<4x8x8xf32>
    %21 = arith.addf %15, %20 : vector<4x8x8xf32>
    %cst_17 = arith.constant dense<0xFF800000> : vector<4x8xf32>
    %22 = vector.multi_reduction <maximumf>, %21, %cst_17 [2] : vector<4x8x8xf32> to vector<4x8xf32>
    %23 = vector.shape_cast %22 : vector<4x8xf32> to vector<4x8x1xf32>
    %24 = vector.broadcast %23 : vector<4x8x1xf32> to vector<4x8x8xf32>
    %25 = arith.subf %21, %24 : vector<4x8x8xf32>
    %26 = math.exp %25 : vector<4x8x8xf32>
    %cst_18 = arith.constant dense<0.000000e+00> : vector<4x8xf32>
    %27 = vector.multi_reduction <add>, %26, %cst_18 [2] : vector<4x8x8xf32> to vector<4x8xf32>
    %28 = vector.shape_cast %27 : vector<4x8xf32> to vector<4x8x1xf32>
    %29 = tpu.reciprocal %28 {approx = true} : vector<4x8x1xf32> -> vector<4x8x1xf32>
    %30 = vector.broadcast %29 : vector<4x8x1xf32> to vector<4x8x8xf32>
    %31 = arith.mulf %26, %30 : vector<4x8x8xf32>
    %32 = arith.truncf %31 : vector<4x8x8xf32> to vector<4x8x8xbf16>
    %c0_19 = arith.constant 0 : index
    %c0_20 = arith.constant 0 : index
    %c0_21 = arith.constant 0 : index
    %33 = vector.load %arg12[%c0_19, %c0_20, %c0_21] : memref<4x8x8xbf16, #tpu.memory_space<vmem>>, vector<4x8x8xbf16>
    "tpu.trace_start"() <{level = 10 : i32, message = "nqk,nkd->nqd"}> : () -> ()
    %cst_22 = arith.constant dense<0.000000e+00> : vector<4x8x8xf32>
    %34 = tpu.matmul %32, %33, %cst_22 {dimension_numbers = #tpu.dot_dimension_numbers<[2], [1], [1], [2], [0, 0, 0, 1, 1, 2], [0], [0]>} : vector<4x8x8xbf16>, vector<4x8x8xbf16>, vector<4x8x8xf32> -> vector<4x8x8xf32>
    "tpu.trace_stop"() : () -> ()
    %35 = arith.truncf %34 : vector<4x8x8xf32> to vector<4x8x8xbf16>
    %36 = tpu.transpose %35, [1, 0, 2] : vector<4x8x8xbf16> -> vector<8x4x8xbf16>
    %37 = vector.shape_cast %36 : vector<8x4x8xbf16> to vector<8x32xbf16>
    %c0_23 = arith.constant 0 : index
    %c0_24 = arith.constant 0 : index
    %38 = vector.load %arg8[%c0_23, %c0_24] : memref<32x32xbf16, #tpu.memory_space<vmem>>, vector<32x32xbf16>
    %cst_25 = arith.constant dense<0.000000e+00> : vector<8x32xf32>
    %39 = tpu.matmul %37, %38, %cst_25 {dimension_numbers = #tpu.dot_dimension_numbers<[1], [0], [0], [1], [0, 0, 1, 1], [], []>} : vector<8x32xbf16>, vector<32x32xbf16>, vector<8x32xf32> -> vector<8x32xf32>
    %c0_26 = arith.constant 0 : index
    %c0_27 = arith.constant 0 : index
    %40 = vector.load %arg9[%c0_26, %c0_27] : memref<1x32xf32, #tpu.memory_space<vmem>>, vector<1x32xf32>
    %41 = vector.broadcast %40 : vector<1x32xf32> to vector<8x32xf32>
    %42 = arith.addf %39, %41 : vector<8x32xf32>
    %c0_28 = arith.constant 0 : index
    %c0_29 = arith.constant 0 : index
    %c0_30 = arith.constant 0 : index
    %43 = vector.load %arg10[%c0_28, %c0_29, %c0_30] : memref<1x8x32xf32, #tpu.memory_space<vmem>>, vector<1x8x32xf32>
    %44 = vector.shape_cast %43 : vector<1x8x32xf32> to vector<8x32xf32>
    %45 = vector.shape_cast %42 : vector<8x32xf32> to vector<1x8x32xf32>
    tpu.vector_store %arg10[%c0_28, %c0_29, %c0_30], %45 {strides = array<i32>} : memref<1x8x32xf32, #tpu.memory_space<vmem>>, vector<1x8x32xf32>,
    return
  }
  func.func @transform_0(%arg0: i32, %arg1: i32) -> (i32, i32, i32) {
    %c0_i32 = arith.constant 0 : i32
    %c0_i32_0 = arith.constant 0 : i32
    return %arg0, %arg1, %c0_i32 : i32, i32, i32
  }
  func.func @transform_1(%arg0: i32, %arg1: i32) -> (i32, i32, i32) {
    %c0_i32 = arith.constant 0 : i32
    %c0_i32_0 = arith.constant 0 : i32
    %c0_i32_1 = arith.constant 0 : i32
    return %arg0, %c0_i32, %c0_i32_0 : i32, i32, i32
  }
  func.func @transform_2(%arg0: i32, %arg1: i32) -> (i32, i32, i32) {
    %c0_i32 = arith.constant 0 : i32
    %c0_i32_0 = arith.constant 0 : i32
    %c0_i32_1 = arith.constant 0 : i32
    return %arg0, %c0_i32, %c0_i32_0 : i32, i32, i32
  }
  func.func @transform_3(%arg0: i32, %arg1: i32) -> (i32, i32, i32, i32) {
    %c0_i32 = arith.constant 0 : i32
    %c0_i32_0 = arith.constant 0 : i32
    %c0_i32_1 = arith.constant 0 : i32
    return %arg0, %c0_i32, %arg1, %c0_i32_0 : i32, i32, i32, i32
  }
  func.func @transform_4(%arg0: i32, %arg1: i32) -> (i32, i32, i32) {
    %c0_i32 = arith.constant 0 : i32
    %c0_i32_0 = arith.constant 0 : i32
    %c0_i32_1 = arith.constant 0 : i32
    %c0_i32_2 = arith.constant 0 : i32
    return %c0_i32, %c0_i32_0, %c0_i32_1 : i32, i32, i32
  }
  func.func @transform_5(%arg0: i32, %arg1: i32) -> (i32, i32, i32) {
    %c0_i32 = arith.constant 0 : i32
    %c0_i32_0 = arith.constant 0 : i32
    %c0_i32_1 = arith.constant 0 : i32
    %c0_i32_2 = arith.constant 0 : i32
    return %c0_i32, %c0_i32_0, %c0_i32_1 : i32, i32, i32
  }
  func.func @transform_6(%arg0: i32, %arg1: i32) -> (i32, i32) {
    %c0_i32 = arith.constant 0 : i32
    %c0_i32_0 = arith.constant 0 : i32
    %c0_i32_1 = arith.constant 0 : i32
    return %c0_i32, %c0_i32_0 : i32, i32
  }
  func.func @transform_7(%arg0: i32, %arg1: i32) -> (i32, i32) {
    %c0_i32 = arith.constant 0 : i32
    %c0_i32_0 = arith.constant 0 : i32
    %c0_i32_1 = arith.constant 0 : i32
    return %c0_i32, %c0_i32_0 : i32, i32
  }
  func.func @transform_8(%arg0: i32, %arg1: i32) -> (i32, i32, i32) {
    %c0_i32 = arith.constant 0 : i32
    %c0_i32_0 = arith.constant 0 : i32
    return %arg0, %arg1, %c0_i32 : i32, i32, i32
  }
}

module attributes {stable_mosaic.version = 11 : i64} {
  func.func @_attention_kernel(%arg0: i32, %arg1: i32, %arg2: memref<1x8x32xbf16, #tpu.memory_space<vmem>>, %arg3: memref<1x8x32xbf16, #tpu.memory_space<vmem>>, %arg4: memref<1x8x32xbf16, #tpu.memory_space<vmem>>, %arg5: memref<1x1x8x8xbf16, #tpu.memory_space<vmem>>, %arg6: memref<3x32x32xbf16, #tpu.memory_space<vmem>>, %arg7: memref<3x1x32xf32, #tpu.memory_space<vmem>>, %arg8: memref<32x32xbf16, #tpu.memory_space<vmem>>, %arg9: memref<1x32xf32, #tpu.memory_space<vmem>>, %arg10: memref<1x8x32xf32, #tpu.memory_space<vmem>>, %arg11: memref<4x8x8xbf16, #tpu.memory_space<vmem>>, %arg12: memref<4x8x8xbf16, #tpu.memory_space<vmem>>) attributes {dimension_semantics = [#tpu.dimension_semantics<parallel>, #tpu.dimension_semantics<arbitrary>], iteration_bounds = array<i64: 2, 1>, scalar_prefetch = 0 : i64, scratch_operands = 2 : i64, tpu.core_type = #tpu.core_type<tc>, window_params = [{transform_indices = @transform_0, window_bounds = array<i64: 1, 8, 32>}, {transform_indices = @transform_1, window_bounds = array<i64: 1, 8, 32>}, {transform_indices = @transform_2, window_bounds = array<i64: 1, 8, 32>}, {transform_indices = @transform_3, window_bounds = array<i64: 1, 1, 8, 8>}, {pipeline_mode = #tpu.pipeline_mode<synchronous>, transform_indices = @transform_4, window_bounds = array<i64: 3, 32, 32>}, {pipeline_mode = #tpu.pipeline_mode<synchronous>, transform_indices = @transform_5, window_bounds = array<i64: 3, 1, 32>}, {pipeline_mode = #tpu.pipeline_mode<synchronous>, transform_indices = @transform_6, window_bounds = array<i64: 32, 32>}, {pipeline_mode = #tpu.pipeline_mode<synchronous>, transform_indices = @transform_7, window_bounds = array<i64: 1, 32>}, {transform_indices = @transform_8, window_bounds = array<i64: 1, 8, 32>}]} {
    %c0_i32 = arith.constant 0 : i32
    %0 = arith.cmpi eq, %arg1, %c0_i32 : i32
    %1 = arith.extui %0 : i1 to i32
    %c0_i32_0 = arith.constant 0 : i32
    %2 = arith.cmpi ne, %1, %c0_i32_0 : i32
    scf.if %2 {
      %c0_31 = arith.constant 0 : index
      %c0_32 = arith.constant 0 : index
      %c0_33 = arith.constant 0 : index
      %46 = vector.load %arg3[%c0_31, %c0_32, %c0_33] : memref<1x8x32xbf16, #tpu.memory_space<vmem>>, vector<1x8x32xbf16>
      %47 = vector.shape_cast %46 : vector<1x8x32xbf16> to vector<8x32xbf16>
      %c0_34 = arith.constant 0 : index
      %c0_35 = arith.constant 0 : index
      %c0_36 = arith.constant 0 : index
      %48 = vector.load %arg4[%c0_34, %c0_35, %c0_36] : memref<1x8x32xbf16, #tpu.memory_space<vmem>>, vector<1x8x32xbf16>
      %49 = vector.shape_cast %48 : vector<1x8x32xbf16> to vector<8x32xbf16>
      %c1 = arith.constant 1 : index
      %c0_37 = arith.constant 0 : index
      %c0_38 = arith.constant 0 : index
      %50 = vector.load %arg6[%c1, %c0_37, %c0_38] : memref<3x32x32xbf16, #tpu.memory_space<vmem>>, vector<1x32x32xbf16>
      %51 = vector.shape_cast %50 : vector<1x32x32xbf16> to vector<32x32xbf16>
      %cst_39 = arith.constant dense<0.000000e+00> : vector<8x32xf32>
      %52 = tpu.matmul %47, %51, %cst_39 {dimension_numbers = #tpu.dot_dimension_numbers<[1], [0], [0], [1], [0, 0, 1, 1], [], []>} : vector<8x32xbf16>, vector<32x32xbf16>, vector<8x32xf32> -> vector<8x32xf32>
      %c1_40 = arith.constant 1 : index
      %c0_41 = arith.constant 0 : index
      %c0_42 = arith.constant 0 : index
      %53 = vector.load %arg7[%c1_40, %c0_41, %c0_42] : memref<3x1x32xf32, #tpu.memory_space<vmem>>, vector<1x1x32xf32>
      %54 = vector.shape_cast %53 : vector<1x1x32xf32> to vector<1x32xf32>
      %55 = vector.broadcast %54 : vector<1x32xf32> to vector<8x32xf32>
      %56 = arith.addf %52, %55 : vector<8x32xf32>
      %c2 = arith.constant 2 : index
      %c0_43 = arith.constant 0 : index
      %c0_44 = arith.constant 0 : index
      %57 = vector.load %arg6[%c2, %c0_43, %c0_44] : memref<3x32x32xbf16, #tpu.memory_space<vmem>>, vector<1x32x32xbf16>
      %58 = vector.shape_cast %57 : vector<1x32x32xbf16> to vector<32x32xbf16>
      %cst_45 = arith.constant dense<0.000000e+00> : vector<8x32xf32>
      %59 = tpu.matmul %49, %58, %cst_45 {dimension_numbers = #tpu.dot_dimension_numbers<[1], [0], [0], [1], [0, 0, 1, 1], [], []>} : vector<8x32xbf16>, vector<32x32xbf16>, vector<8x32xf32> -> vector<8x32xf32>
      %c2_46 = arith.constant 2 : index
      %c0_47 = arith.constant 0 : index
      %c0_48 = arith.constant 0 : index
      %60 = vector.load %arg7[%c2_46, %c0_47, %c0_48] : memref<3x1x32xf32, #tpu.memory_space<vmem>>, vector<1x1x32xf32>
      %61 = vector.shape_cast %60 : vector<1x1x32xf32> to vector<1x32xf32>
      %62 = vector.broadcast %61 : vector<1x32xf32> to vector<8x32xf32>
      %63 = arith.addf %59, %62 : vector<8x32xf32>
      %64 = arith.truncf %56 : vector<8x32xf32> to vector<8x32xbf16>
      %65 = vector.shape_cast %64 : vector<8x32xbf16> to vector<8x4x8xbf16>
      %66 = arith.truncf %63 : vector<8x32xf32> to vector<8x32xbf16>
      %67 = vector.shape_cast %66 : vector<8x32xbf16> to vector<8x4x8xbf16>
      %68 = tpu.transpose %65, [1, 0, 2] : vector<8x4x8xbf16> -> vector<4x8x8xbf16>
      %c0_49 = arith.constant 0 : index
      %c0_50 = arith.constant 0 : index
      %c0_51 = arith.constant 0 : index
      %69 = vector.load %arg11[%c0_49, %c0_50, %c0_51] : memref<4x8x8xbf16, #tpu.memory_space<vmem>>, vector<4x8x8xbf16>
      tpu.vector_store %arg11[%c0_49, %c0_50, %c0_51], %68 {strides = array<i32>} : memref<4x8x8xbf16, #tpu.memory_space<vmem>>, vector<4x8x8xbf16>,
      %70 = tpu.transpose %67, [1, 0, 2] : vector<8x4x8xbf16> -> vector<4x8x8xbf16>
      %c0_52 = arith.constant 0 : index
      %c0_53 = arith.constant 0 : index
      %c0_54 = arith.constant 0 : index
      %71 = vector.load %arg12[%c0_52, %c0_53, %c0_54] : memref<4x8x8xbf16, #tpu.memory_space<vmem>>, vector<4x8x8xbf16>
      tpu.vector_store %arg12[%c0_52, %c0_53, %c0_54], %70 {strides = array<i32>} : memref<4x8x8xbf16, #tpu.memory_space<vmem>>, vector<4x8x8xbf16>,
    } else {
    }
    %c0 = arith.constant 0 : index
    %c0_1 = arith.constant 0 : index
    %c0_2 = arith.constant 0 : index
    %3 = vector.load %arg2[%c0, %c0_1, %c0_2] : memref<1x8x32xbf16, #tpu.memory_space<vmem>>, vector<1x8x32xbf16>
    %4 = vector.shape_cast %3 : vector<1x8x32xbf16> to vector<8x32xbf16>
    %c0_3 = arith.constant 0 : index
    %c0_4 = arith.constant 0 : index
    %c0_5 = arith.constant 0 : index
    %5 = vector.load %arg6[%c0_3, %c0_4, %c0_5] : memref<3x32x32xbf16, #tpu.memory_space<vmem>>, vector<1x32x32xbf16>
    %6 = vector.shape_cast %5 : vector<1x32x32xbf16> to vector<32x32xbf16>
    %cst = arith.constant dense<0.000000e+00> : vector<8x32xf32>
    %7 = tpu.matmul %4, %6, %cst {dimension_numbers = #tpu.dot_dimension_numbers<[1], [0], [0], [1], [0, 0, 1, 1], [], []>} : vector<8x32xbf16>, vector<32x32xbf16>, vector<8x32xf32> -> vector<8x32xf32>
    %c0_6 = arith.constant 0 : index
    %c0_7 = arith.constant 0 : index
    %c0_8 = arith.constant 0 : index
    %8 = vector.load %arg7[%c0_6, %c0_7, %c0_8] : memref<3x1x32xf32, #tpu.memory_space<vmem>>, vector<1x1x32xf32>
    %9 = vector.shape_cast %8 : vector<1x1x32xf32> to vector<1x32xf32>
    %10 = vector.broadcast %9 : vector<1x32xf32> to vector<8x32xf32>
    %11 = arith.addf %7, %10 : vector<8x32xf32>
    %12 = arith.truncf %11 : vector<8x32xf32> to vector<8x32xbf16>
    %13 = vector.shape_cast %12 : vector<8x32xbf16> to vector<8x4x8xbf16>
    %c0_9 = arith.constant 0 : index
    %c0_10 = arith.constant 0 : index
    %c0_11 = arith.constant 0 : index
    %14 = vector.load %arg11[%c0_9, %c0_10, %c0_11] : memref<4x8x8xbf16, #tpu.memory_space<vmem>>, vector<4x8x8xbf16>
    "tpu.trace_start"() <{level = 10 : i32, message = "qnd,nkd->nqk"}> : () -> ()
    %cst_12 = arith.constant dense<0.000000e+00> : vector<4x8x8xf32>
    %15 = tpu.matmul %13, %14, %cst_12 {dimension_numbers = #tpu.dot_dimension_numbers<[2], [2], [0], [1], [0, 1, 0, 0, 1, 1], [1], [0]>} : vector<8x4x8xbf16>, vector<4x8x8xbf16>, vector<4x8x8xf32> -> vector<4x8x8xf32>
    "tpu.trace_stop"() : () -> ()
    %c0_13 = arith.constant 0 : index
    %c0_14 = arith.constant 0 : index
    %c0_15 = arith.constant 0 : index
    %c0_16 = arith.constant 0 : index
    %16 = vector.load %arg5[%c0_13, %c0_14, %c0_15, %c0_16] : memref<1x1x8x8xbf16, #tpu.memory_space<vmem>>, vector<1x1x8x8xbf16>
    %17 = vector.shape_cast %16 : vector<1x1x8x8xbf16> to vector<8x8xbf16>
    %18 = arith.extf %17 : vector<8x8xbf16> to vector<8x8xf32>
    %19 = vector.shape_cast %18 : vector<8x8xf32> to vector<1x8x8xf32>
    %20 = vector.broadcast %19 : vector<1x8x8xf32> to vector<4x8x8xf32>
    %21 = arith.addf %15, %20 : vector<4x8x8xf32>
    %cst_17 = arith.constant dense<0xFF800000> : vector<4x8xf32>
    %22 = vector.multi_reduction <maximumf>, %21, %cst_17 [2] : vector<4x8x8xf32> to vector<4x8xf32>
    %23 = vector.shape_cast %22 : vector<4x8xf32> to vector<4x8x1xf32>
    %24 = vector.broadcast %23 : vector<4x8x1xf32> to vector<4x8x8xf32>
    %25 = arith.subf %21, %24 : vector<4x8x8xf32>
    %26 = math.exp %25 : vector<4x8x8xf32>
    %cst_18 = arith.constant dense<0.000000e+00> : vector<4x8xf32>
    %27 = vector.multi_reduction <add>, %26, %cst_18 [2] : vector<4x8x8xf32> to vector<4x8xf32>
    %28 = vector.shape_cast %27 : vector<4x8xf32> to vector<4x8x1xf32>
    %29 = tpu.reciprocal %28 {approx = true} : vector<4x8x1xf32> -> vector<4x8x1xf32>
    %30 = vector.broadcast %29 : vector<4x8x1xf32> to vector<4x8x8xf32>
    %31 = arith.mulf %26, %30 : vector<4x8x8xf32>
    %32 = arith.truncf %31 : vector<4x8x8xf32> to vector<4x8x8xbf16>
    %c0_19 = arith.constant 0 : index
    %c0_20 = arith.constant 0 : index
    %c0_21 = arith.constant 0 : index
    %33 = vector.load %arg12[%c0_19, %c0_20, %c0_21] : memref<4x8x8xbf16, #tpu.memory_space<vmem>>, vector<4x8x8xbf16>
    "tpu.trace_start"() <{level = 10 : i32, message = "nqk,nkd->nqd"}> : () -> ()
    %cst_22 = arith.constant dense<0.000000e+00> : vector<4x8x8xf32>
    %34 = tpu.matmul %32, %33, %cst_22 {dimension_numbers = #tpu.dot_dimension_numbers<[2], [1], [1], [2], [0, 0, 0, 1, 1, 2], [0], [0]>} : vector<4x8x8xbf16>, vector<4x8x8xbf16>, vector<4x8x8xf32> -> vector<4x8x8xf32>
    "tpu.trace_stop"() : () -> ()
    %35 = arith.truncf %34 : vector<4x8x8xf32> to vector<4x8x8xbf16>
    %36 = tpu.transpose %35, [1, 0, 2] : vector<4x8x8xbf16> -> vector<8x4x8xbf16>
    %37 = vector.shape_cast %36 : vector<8x4x8xbf16> to vector<8x32xbf16>
    %c0_23 = arith.constant 0 : index
    %c0_24 = arith.constant 0 : index
    %38 = vector.load %arg8[%c0_23, %c0_24] : memref<32x32xbf16, #tpu.memory_space<vmem>>, vector<32x32xbf16>
    %cst_25 = arith.constant dense<0.000000e+00> : vector<8x32xf32>
    %39 = tpu.matmul %37, %38, %cst_25 {dimension_numbers = #tpu.dot_dimension_numbers<[1], [0], [0], [1], [0, 0, 1, 1], [], []>} : vector<8x32xbf16>, vector<32x32xbf16>, vector<8x32xf32> -> vector<8x32xf32>
    %c0_26 = arith.constant 0 : index
    %c0_27 = arith.constant 0 : index
    %40 = vector.load %arg9[%c0_26, %c0_27] : memref<1x32xf32, #tpu.memory_space<vmem>>, vector<1x32xf32>
    %41 = vector.broadcast %40 : vector<1x32xf32> to vector<8x32xf32>
    %42 = arith.addf %39, %41 : vector<8x32xf32>
    %c0_28 = arith.constant 0 : index
    %c0_29 = arith.constant 0 : index
    %c0_30 = arith.constant 0 : index
    %43 = vector.load %arg10[%c0_28, %c0_29, %c0_30] : memref<1x8x32xf32, #tpu.memory_space<vmem>>, vector<1x8x32xf32>
    %44 = vector.shape_cast %43 : vector<1x8x32xf32> to vector<8x32xf32>
    %45 = vector.shape_cast %42 : vector<8x32xf32> to vector<1x8x32xf32>
    tpu.vector_store %arg10[%c0_28, %c0_29, %c0_30], %45 {strides = array<i32>} : memref<1x8x32xf32, #tpu.memory_space<vmem>>, vector<1x8x32xf32>,
    return
  }
  func.func @transform_0(%arg0: i32, %arg1: i32) -> (i32, i32, i32) {
    %c0_i32 = arith.constant 0 : i32
    %c0_i32_0 = arith.constant 0 : i32
    return %arg0, %arg1, %c0_i32 : i32, i32, i32
  }
  func.func @transform_1(%arg0: i32, %arg1: i32) -> (i32, i32, i32) {
    %c0_i32 = arith.constant 0 : i32
    %c0_i32_0 = arith.constant 0 : i32
    %c0_i32_1 = arith.constant 0 : i32
    return %arg0, %c0_i32, %c0_i32_0 : i32, i32, i32
  }
  func.func @transform_2(%arg0: i32, %arg1: i32) -> (i32, i32, i32) {
    %c0_i32 = arith.constant 0 : i32
    %c0_i32_0 = arith.constant 0 : i32
    %c0_i32_1 = arith.constant 0 : i32
    return %arg0, %c0_i32, %c0_i32_0 : i32, i32, i32
  }
  func.func @transform_3(%arg0: i32, %arg1: i32) -> (i32, i32, i32, i32) {
    %c0_i32 = arith.constant 0 : i32
    %c0_i32_0 = arith.constant 0 : i32
    %c0_i32_1 = arith.constant 0 : i32
    return %arg0, %c0_i32, %arg1, %c0_i32_0 : i32, i32, i32, i32
  }
  func.func @transform_4(%arg0: i32, %arg1: i32) -> (i32, i32, i32) {
    %c0_i32 = arith.constant 0 : i32
    %c0_i32_0 = arith.constant 0 : i32
    %c0_i32_1 = arith.constant 0 : i32
    %c0_i32_2 = arith.constant 0 : i32
    return %c0_i32, %c0_i32_0, %c0_i32_1 : i32, i32, i32
  }
  func.func @transform_5(%arg0: i32, %arg1: i32) -> (i32, i32, i32) {
    %c0_i32 = arith.constant 0 : i32
    %c0_i32_0 = arith.constant 0 : i32
    %c0_i32_1 = arith.constant 0 : i32
    %c0_i32_2 = arith.constant 0 : i32
    return %c0_i32, %c0_i32_0, %c0_i32_1 : i32, i32, i32
  }
  func.func @transform_6(%arg0: i32, %arg1: i32) -> (i32, i32) {
    %c0_i32 = arith.constant 0 : i32
    %c0_i32_0 = arith.constant 0 : i32
    %c0_i32_1 = arith.constant 0 : i32
    return %c0_i32, %c0_i32_0 : i32, i32
  }
  func.func @transform_7(%arg0: i32, %arg1: i32) -> (i32, i32) {
    %c0_i32 = arith.constant 0 : i32
    %c0_i32_0 = arith.constant 0 : i32
    %c0_i32_1 = arith.constant 0 : i32
    return %c0_i32, %c0_i32_0 : i32, i32
  }
  func.func @transform_8(%arg0: i32, %arg1: i32) -> (i32, i32, i32) {
    %c0_i32 = arith.constant 0 : i32
    %c0_i32_0 = arith.constant 0 : i32
    return %arg0, %arg1, %c0_i32 : i32, i32, i32
  }
}

</mosaic_0001>

<bundles_post_ra>
// kernel: tpu_custom_call.1
= control target key start
LH: loop header
LB: loop body
LE: loop exit
PB: predicated region body
PF: predicated region fallthrough
CT: control target
= control target key end

     0   :  { %s2976_s0 = inlined_call_operand.hbm [shape: bf16[2,8,32], index: 0, kind: input, shape index: {}]   ;;  %s2977_s1 = inlined_call_operand.hbm [shape: bf16[2,8,32], index: 1, kind: input, shape index: {}]   ;;  %s2978_s2 = inlined_call_operand.hbm [shape: bf16[2,8,32], index: 2, kind: input, shape index: {}]   ;;  %s2979_s3 = inlined_call_operand.hbm [shape: bf16[2,1,8,8], index: 3, kind: input, shape index: {}]   ;;  %s2980_s4 = inlined_call_operand.hbm [shape: bf16[3,32,32], index: 4, kind: input, shape index: {}]   ;;  %s2981_s5 = inlined_call_operand.vmem [shape: f32[3,1,32], index: 5, kind: input, shape index: {}]   ;;  %s2982_s6 = inlined_call_operand.hbm [shape: bf16[32,32], index: 6, kind: input, shape index: {}]   ;;  %s2983_s7 = inlined_call_operand.vmem [shape: f32[1,32], index: 7, kind: input, shape index: {}]   ;;  %s2984_s8 = inlined_call_operand.hbm [shape: f32[2,8,32], index: 8, kind: output, shape index: {}]  }
   0x1   :  { %3000 = sst [smem:[#allocation27_spill]] %s2977_s1 }
   0x2   :  { %3001 = sst [smem:[#allocation28_spill]] %s2980_s4 }
   0x3   :  { %3002 = sst [smem:[#allocation29_spill]] %s2983_s7 }
   0x4   :  { %3003 = sst [smem:[#allocation30_spill]] %s2984_s8 }
   0x5   :  { %13 = vsyncpa [#allocation5], 0 }
   0x6   :  { %15 = vsyncpa [#allocation5 + $0x1], 0 }
   0x7   :  { %16 = vsyncpa [#allocation8], 0 }
   0x8   :  { %18 = vsyncpa [#allocation8 + $0x1], 0 }
   0x9   :  { %19 = vsyncpa [#allocation11], 0 }
   0xa   :  { %21 = vsyncpa [#allocation11 + $0x1], 0 }
   0xb   :  { %22 = vsyncpa [#allocation14], 0 }
   0xc   :  { %23 = vsyncpa [#allocation6], 0 }
   0xd   :  { %25 = vsyncpa [#allocation6 + $0x1], 0  ;;  %s2527_s27 = smov 0   ;;  %s2529_s28 = smov 0  }
   0xe   :  { %s2531_s29 = smov 0   ;;  %s2533_s30 = smov 0  }
   0xf   :  { %s2535_s9 = smov 0   ;;  %s2537_s10 = smov 0  }
  0x10 LB: > { %3004 = sst [smem:[#allocation22_spill]] %s2440_s27  ;;  %s2558_s11 = sadd.s32 4294967295, %s2460_s10   ;;  %s2460_s10 = sphi %s2537_s10, %s31_s10   ;;  %s2456_s9 = sphi %s2535_s9, %s3041_s9   ;;  %s2452_s30 = sphi %s2533_s30, %s3040_s30   ;;  %s2448_s29 = sphi %s2531_s29, %s3044_s29   ;;  %s2444_s28 = sphi %s2529_s28, %s3043_s28   ;;  %s2440_s27 = sphi %s2527_s27, %s3042_s27  }
  0x11   : > { %3005 = sst [smem:[#allocation23_spill]] %s2456_s9  ;;  %s1906_s12 = sadd.s32 4294967294, %s2460_s10  }
  0x12   : > { %p65_p0 = scmp.ne.s32.totalorder %s2444_s28, %s2440_s27  ;;  %p2992_p1 = scmp.eq.s32.totalorder %s2558_s11, 0 }
  0x13   : > { %p261_p3 = scmp.eq.s32.totalorder %s1906_s12, 1  ;;  %p1907_p5 = scmp.ge.s32.totalorder %s2460_s10, 1 }
  0x14   : > { %p2567_p4 = por %p2992_p1, %p65_p0  ;;  %p268_p7 = scmp.lt.s32.totalorder %s2460_s10, 3 }
  0x15   : > { %p2572_p6 = por %p261_p3, %p65_p0  ;;  %s2462_s16 = smov [#allocation12]  }
  0x16   : > { %s3006_s13 = scalar_select %p2567_p4, 1, 0 }
  0x17   : > { %s3007_s14 = scalar_select %p2572_p6, 1, 0 }
  0x18   : > { %p2577_p8 = pnand %p1907_p5, %p268_p7  ;;  %s280_s17 = sshll.u32 %s2462_s16, 4  ;;  %s281_s17 = int_to_ptr.vmem [resolvable:$true] %s280_s17 }
  0x19   : > { %3008 = sst [smem:[#allocation24_spill]] %s3007_s14  ;;  %s43_s19 = sadd.s32 1, %s2456_s9 }
  0x1a   : > { %s3009_s15 = scalar_select %p2577_p8, 1, 0 }
  0x1b   : > { %p2083_p9 = pneg %p2577_p8  ;;  %s2211_s20 = scalar_lea.vmem %s281_s17, 768 }
  0x1c   : > { %p2212_p13 = scmp.ne.s32.totalorder %s281_s17, %s2211_s20  ;;  %p2219_p5 = scmp.lt.s32.totalorder %s281_s17, %s281_s17 }
  0x1d   : > { %p2586_p11 = pnand %p2083_p9, %p2992_p1  ;;  %p2220_p7 = scmp.lt.s32.totalorder %s2211_s20, %s2211_s20 }
  0x1f   : > { %p2993_p12 = pneg %p2586_p11  ;;  %p2221_p2 = por %p2220_p7, %p2219_p5 }
  0x21   : > { %p2214_p0 = pnand %p2212_p13, %p2993_p12 }
  0x23   : > { %p2215_p3 = pneg %p2214_p0 }
  0x25   : > { %p2222_p10 = pnand %p2221_p2, %p2215_p3 }
  0x27   : > { %2225 = shalt.err (!%p2222_p10)
}
  0x28   : > { %s2985_s21 = smov 64   ;;  %s2986_s22 = smov 4  }
  0x29   : > { %s3011_s4 = sld [smem:[#allocation28_spill]]  ;;  %p45_p2 = scmp.ge.s32.totalorder %s43_s19, 2 }
  0x2a   : > { %s52_s25 = sadd.s32 1, %s2448_s29  ;;  %p59_p9 = scmp.ne.s32.totalorder %s2448_s29, %s2444_s28 }
  0x2b   : > { %p60_p10 = scmp.eq.s32.totalorder %s2460_s10, 0  ;;  %s3046_s19 = smov (%p45_p2, %s43_s19), 0 }
  0x2c   : > { %3012 = sst [smem:[#allocation25_spill]] %s3046_s19  ;;  %p3013_p0 = scmp.eq.s32.totalorder %s2558_s11, 1 }
  0x2d   : > { %p61_p13 = por %p60_p10, %p59_p9  ;;  %s47_s12 = ssub.s32 %s2456_s9, %s3046_s19 }
  0x2e   : > { %p2612_p3 = por %p3013_p0, %p59_p9  ;;  %p2109_p5 = scmp.lt.s32.totalorder %s2460_s10, 2 }
  0x2f   : > { %2086 = dma.hbm_to_vmem [thread:$0]  (!%p2586_p11), %s3011_s4, 768, %s281_s17, [#allocation11], %s2985_s21, %s2985_s21, %s2986_s22  }
  0x30   : > { %s3014_s26 = scalar_select %p2612_p3, 1, 0 }
  0x31   : > { %p50_p7 = scmp.eq.s32.totalorder %s47_s12, 0  ;;  %s2988_s16 = sand.u32 1, %s2448_s29  }
  0x32   : > { %s2622_s17 = sshll.u32 %s2988_s16, 2  ;;  %s2625_s20 = sshll.u32 %s2456_s9, 6 }
  0x33   : > { %s2628_s23 = scalar_select %p50_p7, %s2448_s29, %s52_s25  }
  0x34   : > { %p2630_p2 = pnand %p2109_p5, %p61_p13  ;;  %s2998_s21 = sand.u32 1, %s2460_s10  }
  0x35   : > { %3015 = sst [smem:[#allocation26_spill]] %s2628_s23  ;;  %s336_s19 = scalar_lea.vmem [#allocation7], %s2622_s17 }
  0x36   : > { %s3017_s1 = sld [smem:[#allocation27_spill]]  ;;  %s343_s16 = sshll.u32 %s336_s19, 4  ;;  %s344_s16 = int_to_ptr.vmem [resolvable:$true] %s343_s16 }
  0x37   : > { %s2642_s9 = scalar_lea.sflag [#allocation8], %s2998_s21  ;;  %p2994_p9 = pneg %p2630_p2 }
  0x38   : > { %s2239_s25 = scalar_lea.vmem %s344_s16, 64  ;;  %s2465_s23 = smov [#allocation7]  }
  0x39   : > { %p2240_p10 = scmp.ne.s32.totalorder %s344_s16, %s2239_s25  ;;  %s2244_s14 = sshll.u32 %s2465_s23, 4  ;;  %s2245_s14 = int_to_ptr.vmem [resolvable:$false] %s2244_s14 }
  0x3a   : > { %s2246_s27 = scalar_lea.vmem %s2245_s14, 128  ;;  %p2247_p5 = scmp.lt.s32.totalorder %s344_s16, %s2245_s14 }
  0x3b   : > { %p2242_p13 = pnand %p2240_p10, %p2994_p9  ;;  %p2248_p7 = scmp.lt.s32.totalorder %s2246_s27, %s2239_s25 }
  0x3c   : > { %s341_s12 = scalar_lea.hbm %s3017_s1, %s2625_s20 }
  0x3d   : > { %p2243_p0 = pneg %p2242_p13  ;;  %p2249_p1 = por %p2248_p7, %p2247_p5 }
  0x3f   : > { %p2250_p12 = pnand %p2249_p1, %p2243_p0 }
  0x41   : > { %2253 = shalt.err (!%p2250_p12)
}
  0x42   : > { %2096 = dma.hbm_to_vmem [thread:$0]  (!%p2630_p2), %s341_s12, 64, %s344_s16, %s2642_s9  }
  0x43   : > { %s2466_s4 = smov [#allocation13]   ;;  %p3018_p13 = pneg %p2586_p11 }
  0x44   : > { %s296_s19 = sshll.u32 %s2466_s4, 4  ;;  %s297_s19 = int_to_ptr.vmem [resolvable:$true] %s296_s19 }
  0x45   : > { %s2265_s22 = scalar_lea.vmem %s297_s19, 256  ;;  %p2273_p3 = scmp.lt.s32.totalorder %s297_s19, %s297_s19 }
  0x46   : > { %p2266_p10 = scmp.ne.s32.totalorder %s297_s19, %s2265_s22  ;;  %p2274_p4 = scmp.lt.s32.totalorder %s2265_s22, %s2265_s22 }
  0x48   : > { %p2268_p9 = pnand %p2266_p10, %p3018_p13  ;;  %p2275_p8 = por %p2274_p4, %p2273_p3 }
  0x4a   : > { %p2269_p6 = pneg %p2268_p9 }
  0x4c   : > { %p2276_p5 = pnand %p2275_p8, %p2269_p6 }
  0x4e   : > { %2279 = shalt.err (!%p2276_p5)
}
  0x4f   : > { %s3019_s27 = smov 4   ;;  %s3020_s14 = smov 64  }
  0x50   : > { %2089 = dma.hbm_to_vmem [thread:$0]  (!%p2586_p11), %s2982_s6, 256, %s297_s19, [#allocation14], %s3020_s14, %s3020_s14, %s3019_s27  }
  0x51   : > { %s323_s4 = scalar_lea.hbm %s2976_s0, %s2625_s20  ;;  %s317_s22 = scalar_lea.vmem [#allocation4], %s2622_s17 }
  0x52   : > { %s325_s21 = sshll.u32 %s317_s22, 4  ;;  %s3021_s1 = sand.u32 1, %s2448_s29   ;;  %s326_s21 = int_to_ptr.vmem [resolvable:$true] %s325_s21 }
  0x53   : > { %s314_s18 = scalar_lea.sflag [#allocation5], %s3021_s1  ;;  %s2293_s8 = scalar_lea.vmem %s326_s21, 64 }
  0x54   : > { %p2294_p1 = scmp.ne.s32.totalorder %s326_s21, %s2293_s8  ;;  %p3022_p4 = pneg %p2630_p2 }
  0x55   : > { %s2467_s16 = smov [#allocation4]  }
  0x56   : > { %p2296_p6 = pnand %p2294_p1, %p3022_p4  ;;  %s2298_s23 = sshll.u32 %s2467_s16, 4  ;;  %s2299_s23 = int_to_ptr.vmem [resolvable:$false] %s2298_s23 }
  0x57   : > { %s2300_s7 = scalar_lea.vmem %s2299_s23, 128  ;;  %p2301_p11 = scmp.lt.s32.totalorder %s326_s21, %s2299_s23 }
  0x58   : > { %p2297_p8 = pneg %p2296_p6  ;;  %p2302_p12 = scmp.lt.s32.totalorder %s2300_s7, %s2293_s8 }
  0x5a   : > { %p2303_p3 = por %p2302_p12, %p2301_p11 }
  0x5c   : > { %p2304_p9 = pnand %p2303_p3, %p2297_p8 }
  0x5e   : > { %2307 = shalt.err (!%p2304_p9)
}
  0x5f   : > { %2093 = dma.hbm_to_vmem [thread:$0]  (!%p2630_p2), %s323_s4, 64, %s326_s21, %s314_s18  }
  0x60   : > { %s359_s27 = scalar_lea.hbm %s2978_s2, %s2625_s20  ;;  %s354_s14 = scalar_lea.vmem [#allocation9], %s2622_s17 }
  0x61   : > { %s361_s12 = sshll.u32 %s354_s14, 4  ;;  %p3023_p7 = pmov %p3022_p4  ;;  %s362_s12 = int_to_ptr.vmem [resolvable:$true] %s361_s12 }
  0x62   : > { %s2321_s25 = scalar_lea.vmem %s362_s12, 64  ;;  %s2468_s7 = smov [#allocation9]  }
  0x63   : > { %p2322_p0 = scmp.ne.s32.totalorder %s362_s12, %s2321_s25  ;;  %s2326_s8 = sshll.u32 %s2468_s7, 4  ;;  %s2327_s8 = int_to_ptr.vmem [resolvable:$false] %s2326_s8 }
  0x64   : > { %s2328_s22 = scalar_lea.vmem %s2327_s8, 128  ;;  %p2329_p5 = scmp.lt.s32.totalorder %s362_s12, %s2327_s8 }
  0x65   : > { %p2324_p10 = pnand %p2322_p0, %p3023_p7  ;;  %p2330_p1 = scmp.lt.s32.totalorder %s2328_s22, %s2321_s25 }
  0x67   : > { %p2325_p13 = pneg %p2324_p10  ;;  %p2331_p4 = por %p2330_p1, %p2329_p5 }
  0x69   : > { %p2332_p6 = pnand %p2331_p4, %p2325_p13 }
  0x6b   : > { %2335 = shalt.err (!%p2332_p6)
}
  0x6c   : > { %2099 = dma.hbm_to_vmem [thread:$0]  (!%p2630_p2), %s359_s27, 64, %s362_s12, %s2642_s9  }
  0x6d   : > { %s378_s18 = scalar_lea.hbm %s2979_s3, %s2625_s20  ;;  %s372_s16 = scalar_lea.vmem [#allocation10], %s2622_s17 }
  0x6e   : > { %s380_s23 = sshll.u32 %s372_s16, 4  ;;  %s3024_s1 = sand.u32 1, %s2460_s10   ;;  %s381_s23 = int_to_ptr.vmem [resolvable:$true] %s380_s23 }
  0x6f   : > { %s369_s19 = scalar_lea.sflag [#allocation11], %s3024_s1  ;;  %s2349_s14 = scalar_lea.vmem %s381_s23, 64 }
  0x70   : > { %p2350_p8 = scmp.ne.s32.totalorder %s381_s23, %s2349_s14  ;;  %p3025_p11 = pmov %p3023_p7 }
  0x71   : > { %s2469_s25 = smov [#allocation10]  }
  0x72   : > { %p2352_p12 = pnand %p2350_p8, %p3025_p11  ;;  %s2354_s7 = sshll.u32 %s2469_s25, 4  ;;  %s2355_s7 = int_to_ptr.vmem [resolvable:$false] %s2354_s7 }
  0x73   : > { %s2356_s8 = scalar_lea.vmem %s2355_s7, 128  ;;  %p2357_p9 = scmp.lt.s32.totalorder %s381_s23, %s2355_s7 }
  0x74   : > { %p2353_p3 = pneg %p2352_p12  ;;  %p2358_p0 = scmp.lt.s32.totalorder %s2356_s8, %s2349_s14 }
  0x76   : > { %p2359_p7 = por %p2358_p0, %p2357_p9 }
  0x78   : > { %p2360_p10 = pnand %p2359_p7, %p2353_p3 }
  0x7a   : > { %2363 = shalt.err (!%p2360_p10)
}
  0x7b   : > { %2102 = dma.hbm_to_vmem [thread:$0]  (!%p2630_p2), %s378_s18, 64, %s381_s23, %s369_s19  }
  0x7c   : > { %p3026_p13 = scmp.ne.s32.totalorder %s3009_s15, 0 }
  0x7d   : > { %s2701_s9 = sand.u32 (!%p3026_p13), 1, %s2444_s28   ;;  %p3027_p5 = scmp.ne.s32.totalorder (!%p3026_p13), %s3006_s13, 0 }
  0x7e   : > { %389 = sbr.rel (%p3026_p13) target bundleno = 1580 (0x62c), region = 52  ;;  %s2704_s17 = sshll.u32 (!%p3026_p13), %s2701_s9, 2 }
  0x7f   : > { %s392_s20 = scalar_lea.sflag (!%p3026_p13), [#allocation5], %s2701_s9  ;;  %s395_s27 = scalar_lea.vmem (!%p3026_p13), [#allocation4], %s2704_s17 }
  0x83   : > { %2415 = dma.done.wait (%p3027_p5), %s392_s20, 64  }
  0x84   : > { %2417 = vsyncadd (%p3027_p5), %s392_s20, 4294967232  ;;  %s400_s15 = sand.u32 1, %s2558_s11   ;;  %s404_s12 = scalar_lea.vmem [#allocation7], %s2704_s17 }
  0x85   : > { %s401_s24 = scalar_lea.sflag [#allocation8], %s400_s15 }
  0x86   : > { %2419 = dma.done.wait (%p3027_p5), %s401_s24, 128  }
  0x87   : > { %2421 = vsyncadd (%p3027_p5), %s401_s24, 4294967168  ;;  %s413_s22 = scalar_lea.vmem [#allocation9], %s2704_s17  ;;  %s419_s21 = scalar_lea.sflag [#allocation11], %s400_s15 }
  0x88   : > { %s422_s4 = scalar_lea.vmem [#allocation10], %s2704_s17 }
  0x89   : > { %2423 = dma.done.wait (%p3027_p5), %s419_s21, 64  }
  0x8a   : > { %2425 = vsyncadd (%p3027_p5), %s419_s21, 4294967232  ;;  %p3028_p2 = scmp.eq.s32.totalorder %s2558_s11, 0 }
  0x8c   : > { %2427 = dma.done.wait (%p3028_p2), [#allocation11], 768   ;;  %p3029_p1 = pmov %p3028_p2 }
  0x8e   : > { %2429 = vsyncadd (%p3029_p1), [#allocation11], 4294966528  ;;  %p3030_p4 = pmov %p3029_p1 }
  0x8f   : > { %p3031_p6 = pmov %p3029_p1 }
  0x90   : > { %2431 = dma.done.wait (%p3030_p4), [#allocation14], 256  }
  0x91   : > { %2433 = vsyncadd (%p3031_p6), [#allocation14], 4294967040  ;;  %v2470_v0 = vmov 0.0   ;;  %vm2471_vm0 = vmmov 0   ;;  %v2176_v1 = vld [vmem:[#allocation12 + $0x18] sm:$0xff]   ;;  %v2177_v2 = vld [vmem:[#allocation12 + $0x10] sm:$0xff]   ;;  %v633_v26 = vlaneseq }
  0x92   : > { %1985 = vmatprep.subr.bf16.mxu0 %v2470_v0  ;;  %1989 = vmatprep.mubr.msk.bf16.mxu0 %vm2471_vm0, %v2470_v0  ;;  %v483_v3 = vld [vmem:[%s404_s12] sm:$0xf]  ;;  %vm510_vm1 = vcmask 261120   ;;  %v2179_v5 = vld [vmem:[#allocation12] sm:$0xff]   ;;  %s2472_s18 = smov 104   ;;  %s2473_s16 = smov 120  }
  0x93   : > { %1993 = vmatprep.subr.bf16.mxu1 %v2470_v0  ;;  %1997 = vmatprep.mubr.msk.bf16.mxu1 %vm2471_vm0, %v2470_v0  ;;  %v2178_v4 = vld [vmem:[#allocation12 + $0x8] sm:$0xff]   ;;  %v977_v6 = vld [vmem:[%s395_s27] sm:$0xf]  ;;  %s2474_s19 = smov 112   ;;  %v484_v23 = vld [vmem:[%s413_s22] sm:$0xf] }
  0x94   : > { %1986 = vmatpush3.bf16.msra.mxu0 %v2176_v1  ;;  %v1928_v7 = vld [vmem:[%s2981_s5 + $0x1] ss:$0 sm:$0xff]  ;;  %v1937_v14 = vld [vmem:[%s2981_s5] ss:$0 sm:$0xff]  ;;  %v2180_v20 = vld [vmem:[#allocation12 + $0x28] sm:$0xff]   ;;  %v634_v30 = vshrl.u32 %v633_v26, 7 }
  0x95   : > { %1987 = vmatprep.subr.bf16.mxu0 %v2470_v0  ;;  %1994 = vmatpush3.bf16.msra.mxu1 %v2180_v20  ;;  %v2181_v22 = vld [vmem:[#allocation12 + $0x20] sm:$0xff]   ;;  %v2475_v24 = vmov 1983009808   ;;  %v2476_v27 = vmov 1934713408   ;;  %v2477_v47 = vmov 0  }
  0x96   : > { %1995 = vmatprep.subr.bf16.mxu1 %v2470_v0  ;;  %v631_v25 = vunpack.c.l.s4 %v2475_v24  ;;  %v648_v28 = vunpack.c.l.s4 %v2476_v27  ;;  %vm902_vm2 = vcmask 60416   ;;  %vm1059_vm3 = vcmask 64512   ;;  %s2478_s7 = smov 8   ;;  %s2479_s8 = smov 16  }
  0x97   : > { %vm1299_vm4 = vcmask 1043456   ;;  %s2480_s17 = smov 24   ;;  %vm1652_vm5 = vcmask 130048   ;;  %vm1655_vm6 = vcmask 195584   ;;  %s1926_s20 = sshll.u32 %s2701_s9, 3 }
  0x98   : > { %1988 = vmatpush3.bf16.msra.mxu0 %v2177_v2  ;;  %v632_v29 = vunpack.c.0.s8 %v631_v25  ;;  %v649_v31 = vunpack.c.0.s8 %v648_v28  ;;  %s3032_s24 = sld [smem:[#allocation29_spill]]  ;;  %s1954_s12 = sshll.u32 %s2452_s30, 7 }
  0x99   : > { %2001 = vmatprep.subr.bf16.mxu0 %v2470_v0  ;;  %1996 = vmatpush3.bf16.msra.mxu1 %v2181_v22  ;;  %s477_s22 = scalar_lea.vmem [#allocation15], %s1926_s20  ;;  %s3033_s13 = sld [smem:[#allocation30_spill]] }
  0x9a   : > { %2009 = vmatprep.subr.bf16.mxu1 %v2470_v0  ;;  %v2774_v32 = vsub.s32 %v632_v29, %v634_v30  ;;  %v2777_v36 = vsub.s32 %v649_v31, %v634_v30  ;;  %s1739_s21 = sshll.u32 %s477_s22, 4  ;;  %p3034_p11 = scmp.ne.s32.totalorder %s3014_s26, 0  ;;  %s2929_s21 = int_to_ptr.vmem [resolvable:$true] %s1739_s21 }
  0x9b   : > { %1990 = vmatmul.mubr.msk.bf16.vlgmr.msra.gmra.mxu0 %vm510_vm1, %v483_v3  ;;  %s2364_s30 = scalar_lea.vmem %s2929_s21, 128  ;;  %s2481_s23 = smov [#allocation15]  }
  0x9c   : > { %2002 = vmatpush3.bf16.msra.mxu0 %v2178_v4  ;;  %2005 = vmatprep.mubr.msk.bf16.mxu0 %vm2471_vm0, %v2470_v0  ;;  %p2365_p8 = scmp.ne.s32.totalorder %s2929_s21, %s2364_s30  ;;  %s2368_s1 = sshll.u32 %s2481_s23, 4  ;;  %s2369_s1 = int_to_ptr.vmem [resolvable:$false] %s2368_s1 }
  0x9d   : > { %2003 = vmatprep.subr.bf16.mxu0 %v2470_v0  ;;  %1998 = vmatmul.mubr.msk.bf16.vlgmr.msra.gmra.mxu1 %vm510_vm1, %v484_v23  ;;  %p2371_p9 = scmp.lt.s32.totalorder %s2929_s21, %s2369_s1 }
  0x9e   : > { %2011 = vmatprep.mubr.msk.bf16.mxu1 %vm2471_vm0, %v2470_v0  ;;  %p2366_p12 = pnand %p2365_p8, %p3034_p11 }
  0xa0   : > { %2004 = vmatpush3.bf16.msra.mxu0 %v2179_v5  ;;  %p2367_p3 = pneg %p2366_p12 }
  0xa1   : > { %2015 = vmatprep.subr.bf16.mxu0 %v2470_v0 }
  0xa3   : > { %2006 = vmatmul.mubr.msk.bf16.vlgmr.msra.gmra.mxu0 %vm510_vm1, %v977_v6 }
  0xa4   : > { %2017 = vmatprep.mubr.msk.bf16.mxu0 %vm2471_vm0, %v2470_v0 }
 0x15b   : > { %v548_v8 = vpop.f32.mrf.mxu0 }
 0x15c   : > { %v549_v9 = vadd.f32 %v1928_v7, %v548_v8 }
 0x15d   : > { %v1991_v10 = vpop.f32.mrf.mxu0 }
 0x15e   : > { %v622_v11 = vpack.c.bf16 %v549_v9, %v549_v9 }
 0x15f   : > { %v551_v12 = vpop.f32.mrf.mxu0 }
 0x160   : > { %628 = vrot.lane.b32.xlu1 %v622_v11, %s2472_s18  ;;  %624 = vrot.lane.b32.xlu0 %v622_v11, %s2473_s16  ;;  %v636_v43 = vrot.slane %v622_v11, %v2774_v32 }
 0x161   : > { %v1992_v13 = vpop.f32.mrf.mxu0 }
 0x163   : > { %v1039_v15 = vpop.f32.mrf.mxu0 }
 0x164   : > { %626 = vrot.lane.b32.xlu0 %v622_v11, %s2474_s19  ;;  %v1040_v16 = vadd.f32 %v1937_v14, %v1039_v15 }
 0x165   : > { %v2007_v17 = vpop.f32.mrf.mxu0 }
 0x166   : > { %v2759_v18 = vpack.c.bf16 %v1040_v16, %v1040_v16 }
 0x167   : > { %v1042_v19 = vpop.f32.mrf.mxu0 }
 0x168   : > { %1047 = vrot.lane.b32.xlu1 %v2759_v18, %s2473_s16  ;;  %1049 = vrot.lane.b32.xlu0 %v2759_v18, %s2474_s19 }
 0x169   : > { %v2008_v21 = vpop.f32.mrf.mxu0 }
 0x16c   : > { %1051 = vrot.lane.b32.xlu1 %v2759_v18, %s2472_s18 }
 0x1d2   : > { %v629_v33 = vpop.permute.xlu1 %628  ;;  %v625_v34 = vpop.permute.xlu0 %624 }
 0x1d3   : > { %v678_v35 = vrot.slane %v629_v33, %v2774_v32  ;;  %v670_v37 = vrot.slane %v625_v34, %v2774_v32 }
 0x1d5   : > { %v679_v38 = vcombine.low %v670_v37, %v678_v35  ;;  %v680_v39 = vcombine.high %v670_v37, %v678_v35 }
 0x1d6   : > { %v627_v40 = vpop.permute.xlu0 %626 }
 0x1d7   : > { %v687_v41 = vrot.slane %v679_v38, %v2777_v36  ;;  %v644_v42 = vrot.slane %v627_v40, %v2774_v32  ;;  %v694_v44 = vrot.slane %v680_v39, %v2777_v36 }
 0x1d9   : > { %v645_v45 = vcombine.low %v636_v43, %v644_v42  ;;  %v646_v46 = vcombine.high %v636_v43, %v644_v42  ;;  %v695_v48 = vcombine.high %v687_v41, %v2477_v47  ;;  %v696_v51 = vcombine.high %v694_v44, %v2477_v47  ;;  %v616_v42 = vpop.f32.mrf.mxu1 }
 0x1da   : > { %v702_v52 = vshrl.u32 %v687_v41, 16  ;;  %v718_v58 = vshrl.u32 %v694_v44, 16  ;;  %v1048_v39 = vpop.permute.xlu1 %1047 }
 0x1db   : > { %v653_v49 = vrot.slane %v645_v45, %v2777_v36  ;;  %v660_v50 = vrot.slane %v646_v46, %v2777_v36  ;;  %v710_v57 = vshrl.u32 %v695_v48, 16  ;;  %v726_v2 = vshrl.u32 %v696_v51, 16  ;;  %v1999_v43 = vpop.f32.mrf.mxu1  ;;  %v1057_v46 = vld [vmem:[%s422_s4] sm:$0xf] }
 0x1dd   : > { %v661_v53 = vcombine.high %v653_v49, %v2477_v47  ;;  %v662_v54 = vcombine.high %v660_v50, %v2477_v47  ;;  %v699_v55 = vpack.i.b16 %v687_v41, %v653_v49  ;;  %v701_v56 = vshrl.u32 %v653_v49, 16 }
 0x1de   : > { %v715_v59 = vpack.i.b16 %v694_v44, %v660_v50  ;;  %v717_v60 = vshrl.u32 %v660_v50, 16  ;;  %v1052_v41 = vpop.permute.xlu1 %1051  ;;  %v619_v44 = vpop.f32.mrf.mxu1 }
 0x1df   : > { %v703_v61 = vpack.i.b16 %v702_v52, %v701_v56  ;;  %v707_v62 = vpack.i.b16 %v695_v48, %v661_v53  ;;  %v709_v63 = vshrl.u32 %v661_v53, 16  ;;  %v723_v1 = vpack.i.b16 %v696_v51, %v662_v54 }
 0x1e0   : > { %v719_v3 = vpack.i.b16 %v718_v58, %v717_v60  ;;  %v725_v4 = vshrl.u32 %v662_v54, 16  ;;  %v836_v5 = vcombine.low %v699_v55, %v715_v59  ;;  %v2000_v45 = vpop.f32.mrf.mxu1  ;;  %v1058_v48 = vunpack.c.l.bf16 %v1057_v46 }
 0x1e1   : > { %v711_v6 = vpack.i.b16 %v710_v57, %v709_v63  ;;  %v844_v7 = vcombine.low %v707_v62, %v723_v1 }
 0x1e2   : > { %v727_v8 = vpack.i.b16 %v726_v2, %v725_v4  ;;  %v861_v9 = vcombine.low %v703_v61, %v719_v3  ;;  %v843_v10 = vrot.slane %v836_v5, %v2774_v32 }
 0x1e3   : > { %v851_v11 = vrot.slane %v844_v7, %v2774_v32 }
 0x1e4   : > { %v869_v12 = vcombine.low %v711_v6, %v727_v8  ;;  %v868_v14 = vrot.slane %v861_v9, %v2774_v32  ;;  %v1933_v6 = vld [vmem:[%s2981_s5 + $0x2] ss:$0 sm:$0xff] }
 0x1e5   : > { %v852_v13 = vcombine.low %v843_v10, %v851_v11  ;;  %v617_v11 = vadd.f32 %v1933_v6, %v616_v42 }
 0x1e6   : > { %v876_v15 = vrot.slane %v869_v12, %v2774_v32 }
 0x1e7   : > { %v859_v16 = vrot.slane %v852_v13, %v2777_v36  ;;  %v729_v12 = vpack.c.bf16 %v617_v11, %v617_v11 }
 0x1e8   : > { %v877_v17 = vcombine.low %v868_v14, %v876_v15 }
 0x1e9   : > { %v860_v19 = vcombine.high %v859_v16, %v2477_v47  ;;  %v890_v23 = vshrl.u32 %v859_v16, 16 }
 0x1ea   : > { %v884_v20 = vrot.slane %v877_v17, %v2777_v36 }
 0x1eb   : > { %v898_v27 = vshrl.u32 %v860_v19, 16 }
 0x1ec   : > { %v885_v21 = vcombine.high %v884_v20, %v2477_v47  ;;  %v888_v22 = vpack.i.b16 %v884_v20, %v859_v16  ;;  %v891_v24 = vshrl.u32 %v884_v20, 16 }
 0x1ee   : > { %v892_v25 = vpack.i.b16 %v891_v24, %v890_v23  ;;  %v896_v26 = vpack.i.b16 %v885_v21, %v860_v19  ;;  %v899_v28 = vshrl.u32 %v885_v21, 16  ;;  %903 = vst.msk [vmem:[#allocation2] sm:$0xf] %vm902_vm2, %v888_v22 }
 0x1f0   : > { %v900_v29 = vpack.i.b16 %v899_v28, %v898_v27  ;;  %904 = vst.msk [vmem:[#allocation2 + $0x4] sm:$0xf] %vm902_vm2, %v892_v25  ;;  %905 = vst.msk [vmem:[#allocation2 + $0x8] sm:$0xf] %vm902_vm2, %v896_v26 }
 0x1f2   : > { %906 = vst.msk [vmem:[#allocation2 + $0xc] sm:$0xf] %vm902_vm2, %v900_v29 }
 0x1f5   : > { %v1053_v30 = vld [vmem:[#allocation2] sm:$0xf] }
 0x1f6   : > { %v1064_v31 = vsel %vm1059_vm3, %v1053_v30, 0 }
 0x1f7   : > { %2010 = vmatpush3.bf16.xpose.msra.mxu1 %v1064_v31  ;;  %v1054_v33 = vld [vmem:[#allocation2 + $0x4] sm:$0xf]  ;;  %v1055_v35 = vld [vmem:[#allocation2 + $0x8] sm:$0xf] }
 0x1f8   : > { %v1110_v34 = vsel %vm1059_vm3, %v1054_v33, 0  ;;  %2021 = vmatprep.subr.bf16.mxu1 %v2470_v0  ;;  %v1156_v38 = vsel %vm1059_vm3, %v1055_v35, 0 }
 0x1f9   : > { %2016 = vmatpush3.bf16.xpose.msra.mxu0 %v1110_v34  ;;  %v1056_v37 = vld [vmem:[#allocation2 + $0xc] sm:$0xf] }
 0x1fa   : > { %2027 = vmatprep.subr.bf16.mxu0 %v2470_v0  ;;  %v1202_v40 = vsel %vm1059_vm3, %v1056_v37, 0 }
 0x1fe   : > { %2012 = vmatmul.mubr.msk.bf16.vlgmr.msra.gmra.mxu1 %vm1059_vm3, %v2759_v18  ;;  %v1050_v18 = vpop.permute.xlu0 %1049 }
 0x1ff   : > { %2022 = vmatpush3.bf16.xpose.msra.mxu1 %v1156_v38  ;;  %2023 = vmatprep.mubr.msk.bf16.mxu1 %vm2471_vm0, %v2470_v0  ;;  %v743_v38 = vrot.slane %v729_v12, %v2774_v32 }
 0x200   : > { %2018 = vmatmul.mubr.msk.bf16.vlgmr.msra.gmra.mxu0 %vm1059_vm3, %v1048_v39  ;;  %2033 = vmatprep.subr.bf16.mxu1 %v2470_v0 }
 0x201   : > { %2028 = vmatpush3.bf16.xpose.msra.mxu0 %v1202_v40  ;;  %2029 = vmatprep.mubr.msk.bf16.mxu0 %vm2471_vm0, %v2470_v0 }
 0x202   : > { %2039 = vmatprep.subr.bf16.mxu0 %v2470_v0 }
 0x206   : > { %2024 = vmatmul.mubr.msk.bf16.vlgmr.msra.gmra.mxu1 %vm1059_vm3, %v1050_v18 }
 0x207   : > { %2035 = vmatprep.mubr.msk.bf16.mxu1 %vm2471_vm0, %v2470_v0 }
 0x208   : > { %2030 = vmatmul.mubr.msk.bf16.vlgmr.msra.gmra.mxu0 %vm1059_vm3, %v1052_v41 }
 0x209   : > { %2041 = vmatprep.mubr.msk.bf16.mxu0 %vm2471_vm0, %v2470_v0 }
 0x2be   : > { %v1100_v49 = vpop.f32.mrf.mxu1 }
 0x2bf   : > { %v1101_v50 = vadd.f32 %v1100_v49, %v1058_v48 }
 0x2c0   : > { %v2013_v51 = vpop.f32.mrf.mxu1  ;;  %v1146_v52 = vpop.f32.mrf.mxu0 }
 0x2c1   : > { %v1147_v53 = vadd.f32 %v1146_v52, %v1058_v48  ;;  %v1244_v54 = vsel %vm1059_vm3, %v1101_v50, -inf }
 0x2c2   : > { %1245 = vmax.xlane.f32.xlu0 %v1244_v54  ;;  %v1103_v55 = vpop.f32.mrf.mxu1  ;;  %v2019_v56 = vpop.f32.mrf.mxu0 }
 0x2c3   : > { %v1247_v57 = vsel %vm1059_vm3, %v1147_v53, -inf }
 0x2c4   : > { %v2014_v58 = vpop.f32.mrf.mxu1  ;;  %1248 = vmax.xlane.f32.xlu1 %v1247_v57  ;;  %v1149_v59 = vpop.f32.mrf.mxu0 }
 0x2c6   : > { %v2020_v60 = vpop.f32.mrf.mxu0  ;;  %v1192_v61 = vpop.f32.mrf.mxu1 }
 0x2c7   : > { %v1193_v62 = vadd.f32 %v1192_v61, %v1058_v48 }
 0x2c8   : > { %v2025_v63 = vpop.f32.mrf.mxu1  ;;  %v1238_v1 = vpop.f32.mrf.mxu0 }
 0x2c9   : > { %v1239_v2 = vadd.f32 %v1238_v1, %v1058_v48  ;;  %v1250_v3 = vsel %vm1059_vm3, %v1193_v62, -inf }
 0x2ca   : > { %1251 = vmax.xlane.f32.xlu0 %v1250_v3  ;;  %v1195_v4 = vpop.f32.mrf.mxu1  ;;  %v2031_v5 = vpop.f32.mrf.mxu0 }
 0x2cb   : > { %v1253_v9 = vsel %vm1059_vm3, %v1239_v2, -inf }
 0x2cc   : > { %v2026_v7 = vpop.f32.mrf.mxu1  ;;  %v1241_v8 = vpop.f32.mrf.mxu0 }
 0x2ce   : > { %1254 = vmax.xlane.f32.xlu0 %v1253_v9  ;;  %v2032_v10 = vpop.f32.mrf.mxu0 }
 0x2d5   : > { %731 = vrot.lane.b32.xlu1 %v729_v12, %s2473_s16  ;;  %s1725_s16 = scalar_lea.sflag [#allocation6], %s2701_s9 }
 0x2d9   : > { %735 = vrot.lane.b32.xlu1 %v729_v12, %s2472_s18  ;;  %s2927_s18 = scalar_lea.hbm %s3033_s13, %s1954_s12 }
 0x2e4   : > { %733 = vrot.lane.b32.xlu0 %v729_v12, %s2474_s19  ;;  %s2370_s19 = scalar_lea.vmem %s2369_s1, 256 }
 0x2e5   : > { %p2372_p0 = scmp.lt.s32.totalorder %s2370_s19, %s2364_s30 }
 0x2e7   : > { %p2373_p7 = por %p2372_p0, %p2371_p9 }
 0x2e9   : > { %p2374_p10 = pnand %p2373_p7, %p2367_p3 }
 0x34b   : > { %v1246_v13 = vpop.xlane.xlu0 %1245 }
 0x34c   : > { %v1256_v14 = vsub.f32 %v1101_v50, %v1246_v13 }
 0x34d   : > { %v1249_v15 = vpop.xlane.xlu1 %1248 }
 0x34e   : > { %v1260_v16 = vmul.f32 1.442695, %v1256_v14  ;;  %v1257_v17 = vsub.f32 %v1147_v53, %v1249_v15 }
 0x350   : > { %2184 = vpow2.f32 %v1260_v16  ;;  %v1262_v19 = vmul.f32 1.442695, %v1257_v17 }
 0x351   : > { %v732_v20 = vpop.permute.xlu1 %731 }
 0x352   : > { %2186 = vpow2.f32 %v1262_v19  ;;  %v777_v24 = vrot.slane %v732_v20, %v2774_v32 }
 0x353   : > { %v1252_v21 = vpop.xlane.xlu0 %1251 }
 0x354   : > { %v1258_v22 = vsub.f32 %v1193_v62, %v1252_v21 }
 0x355   : > { %v736_v23 = vpop.permute.xlu1 %735 }
 0x356   : > { %v1264_v25 = vmul.f32 1.442695, %v1258_v22  ;;  %v785_v26 = vrot.slane %v736_v23, %v2774_v32 }
 0x357   : > { %v1255_v27 = vpop.xlane.xlu0 %1254 }
 0x358   : > { %2188 = vpow2.f32 %v1264_v25  ;;  %v786_v28 = vcombine.low %v777_v24, %v785_v26  ;;  %v787_v29 = vcombine.high %v777_v24, %v785_v26  ;;  %v1259_v30 = vsub.f32 %v1239_v2, %v1255_v27 }
 0x35a   : > { %v1266_v31 = vmul.f32 1.442695, %v1259_v30  ;;  %v794_v34 = vrot.slane %v786_v28, %v2777_v36  ;;  %v801_v35 = vrot.slane %v787_v29, %v2777_v36 }
 0x35b   : > { %v734_v33 = vpop.permute.xlu0 %733 }
 0x35c   : > { %2190 = vpow2.f32 %v1266_v31  ;;  %v751_v39 = vrot.slane %v734_v33, %v2774_v32  ;;  %v802_v43 = vcombine.high %v794_v34, %v2477_v47  ;;  %v803_v44 = vcombine.high %v801_v35, %v2477_v47 }
 0x35d   : > { %v2839_v37 = vpop.eup %2184  ;;  %v809_v49 = vshrl.u32 %v794_v34, 16  ;;  %v825_v50 = vshrl.u32 %v801_v35, 16 }
 0x35e   : > { %v1268_v40 = vsel %vm1059_vm3, %v2839_v37, 0.0  ;;  %v752_v41 = vcombine.low %v743_v38, %v751_v39  ;;  %v753_v42 = vcombine.high %v743_v38, %v751_v39  ;;  %v817_v55 = vshrl.u32 %v802_v43, 16 }
 0x35f   : > { %v2845_v18 = vpop.eup %2186  ;;  %1269 = vadd.xlane.f32.xlu1 %v1268_v40  ;;  %v833_v56 = vshrl.u32 %v803_v44, 16 }
 0x360   : > { %v1271_v45 = vsel %vm1059_vm3, %v2845_v18, 0.0  ;;  %v760_v46 = vrot.slane %v752_v41, %v2777_v36  ;;  %v767_v48 = vrot.slane %v753_v42, %v2777_v36 }
 0x361   : > { %1272 = vadd.xlane.f32.xlu0 %v1271_v45 }
 0x362   : > { %v768_v51 = vcombine.high %v760_v46, %v2477_v47  ;;  %v769_v52 = vcombine.high %v767_v48, %v2477_v47  ;;  %v806_v53 = vpack.i.b16 %v794_v34, %v760_v46  ;;  %v808_v54 = vshrl.u32 %v760_v46, 16 }
 0x363   : > { %v822_v57 = vpack.i.b16 %v801_v35, %v767_v48  ;;  %v824_v58 = vshrl.u32 %v767_v48, 16 }
 0x364   : > { %v810_v60 = vpack.i.b16 %v809_v49, %v808_v54  ;;  %v814_v61 = vpack.i.b16 %v802_v43, %v768_v51  ;;  %v816_v62 = vshrl.u32 %v768_v51, 16  ;;  %v830_v63 = vpack.i.b16 %v803_v44, %v769_v52 }
 0x365   : > { %v2855_v59 = vpop.eup %2188  ;;  %v826_v1 = vpack.i.b16 %v825_v50, %v824_v58  ;;  %v832_v2 = vshrl.u32 %v769_v52, 16  ;;  %v907_v3 = vcombine.low %v806_v53, %v822_v57  ;;  %v2182_v57 = vld [vmem:[#allocation13 + $0x8] sm:$0xff]  }
 0x366   : > { %v1274_v4 = vsel %vm1059_vm3, %v2855_v59, 0.0  ;;  %v818_v5 = vpack.i.b16 %v817_v55, %v816_v62  ;;  %v915_v6 = vcombine.low %v814_v61, %v830_v63 }
 0x367   : > { %1275 = vadd.xlane.f32.xlu0 %v1274_v4  ;;  %v834_v7 = vpack.i.b16 %v833_v56, %v832_v2  ;;  %v932_v8 = vcombine.low %v810_v60, %v826_v1  ;;  %v914_v9 = vrot.slane %v907_v3, %v2774_v32 }
 0x368   : > { %v922_v10 = vrot.slane %v915_v6, %v2774_v32 }
 0x369   : > { %v2861_v11 = vpop.eup %2190  ;;  %v940_v12 = vcombine.low %v818_v5, %v834_v7  ;;  %v939_v15 = vrot.slane %v932_v8, %v2774_v32 }
 0x36a   : > { %v923_v13 = vcombine.low %v914_v9, %v922_v10  ;;  %v1277_v14 = vsel %vm1059_vm3, %v2861_v11, 0.0 }
 0x36b   : > { %v947_v16 = vrot.slane %v940_v12, %v2774_v32  ;;  %1278 = vadd.xlane.f32.xlu1 %v1277_v14 }
 0x36c   : > { %v930_v17 = vrot.slane %v923_v13, %v2777_v36 }
 0x36d   : > { %v948_v19 = vcombine.low %v939_v15, %v947_v16 }
 0x36e   : > { %v931_v20 = vcombine.high %v930_v17, %v2477_v47  ;;  %v961_v24 = vshrl.u32 %v930_v17, 16 }
 0x36f   : > { %v955_v21 = vrot.slane %v948_v19, %v2777_v36 }
 0x370   : > { %v969_v28 = vshrl.u32 %v931_v20, 16 }
 0x371   : > { %v956_v22 = vcombine.high %v955_v21, %v2477_v47  ;;  %v959_v23 = vpack.i.b16 %v955_v21, %v930_v17  ;;  %v962_v25 = vshrl.u32 %v955_v21, 16 }
 0x373   : > { %v963_v26 = vpack.i.b16 %v962_v25, %v961_v24  ;;  %v967_v27 = vpack.i.b16 %v956_v22, %v931_v20  ;;  %v970_v29 = vshrl.u32 %v956_v22, 16  ;;  %973 = vst.msk [vmem:[#allocation3] sm:$0xf] %vm902_vm2, %v959_v23 }
 0x375   : > { %v971_v30 = vpack.i.b16 %v970_v29, %v969_v28  ;;  %974 = vst.msk [vmem:[#allocation3 + $0x4] sm:$0xf] %vm902_vm2, %v963_v26  ;;  %975 = vst.msk [vmem:[#allocation3 + $0x8] sm:$0xf] %vm902_vm2, %v967_v27 }
 0x377   : > { %976 = vst.msk [vmem:[#allocation3 + $0xc] sm:$0xf] %vm902_vm2, %v971_v30 }
 0x37a   : > { %v1292_v31 = vld [vmem:[#allocation3] sm:$0xf] }
 0x37b   : > { %v1301_v33 = vsel %vm1299_vm4, %v1292_v31, 0 }
 0x37c   : > { %2034 = vmatpush3.bf16.msra.mxu1 %v1301_v33  ;;  %v1293_v34 = vld [vmem:[#allocation3 + $0x4] sm:$0xf]  ;;  %v1294_v45 = vld [vmem:[#allocation3 + $0x8] sm:$0xf] }
 0x37d   : > { %v1347_v35 = vsel %vm1299_vm4, %v1293_v34, 0  ;;  %2045 = vmatprep.subr.bf16.mxu1 %v2470_v0  ;;  %v1393_v50 = vsel %vm1299_vm4, %v1294_v45, 0 }
 0x37e   : > { %2040 = vmatpush3.bf16.msra.mxu0 %v1347_v35  ;;  %v1295_v49 = vld [vmem:[#allocation3 + $0xc] sm:$0xf] }
 0x37f   : > { %2051 = vmatprep.subr.bf16.mxu0 %v2470_v0  ;;  %v1439_v52 = vsel %vm1299_vm4, %v1295_v49, 0 }
 0x3e8   : > { %v1270_v38 = vpop.xlane.xlu1 %1269 }
 0x3e9   : > { %2192 = vrcp.f32 %v1270_v38 }
 0x3ea   : > { %v1273_v39 = vpop.xlane.xlu0 %1272 }
 0x3eb   : > { %2194 = vrcp.f32 %v1273_v39 }
 0x3f0   : > { %v1276_v40 = vpop.xlane.xlu0 %1275 }
 0x3f1   : > { %2196 = vrcp.f32 %v1276_v40 }
 0x3f4   : > { %v1279_v41 = vpop.xlane.xlu1 %1278 }
 0x3f5   : > { %2198 = vrcp.f32 %v1279_v41 }
 0x3f6   : > { %v2193_v42 = vpop.eup %2192 }
 0x3f7   : > { %v1284_v43 = vmul.f32 %v2193_v42, %v2839_v37 }
 0x3f8   : > { %v2195_v44 = vpop.eup %2194 }
 0x3f9   : > { %v1288_v46 = vpack.c.bf16 %v1284_v43, %v1284_v43  ;;  %v1285_v48 = vmul.f32 %v2195_v44, %v2845_v18 }
 0x3fb   : > { %2036 = vmatmul.mubr.msk.bf16.vlgmr.msra.gmra.mxu1 %vm1059_vm3, %v1288_v46  ;;  %v1289_v51 = vpack.c.bf16 %v1285_v48, %v1285_v48 }
 0x3fc   : > { %2046 = vmatpush3.bf16.msra.mxu1 %v1393_v50  ;;  %2047 = vmatprep.mubr.msk.bf16.mxu1 %vm2471_vm0, %v2470_v0 }
 0x3fd   : > { %2042 = vmatmul.mubr.msk.bf16.vlgmr.msra.gmra.mxu0 %vm1059_vm3, %v1289_v51  ;;  %2057 = vmatprep.subr.bf16.mxu1 %v2470_v0 }
 0x3fe   : > { %v2197_v37 = vpop.eup %2196  ;;  %2052 = vmatpush3.bf16.msra.mxu0 %v1439_v52  ;;  %2053 = vmatprep.mubr.msk.bf16.mxu0 %vm2471_vm0, %v2470_v0 }
 0x3ff   : > { %v1286_v18 = vmul.f32 %v2197_v37, %v2855_v59 }
 0x401   : > { %v1290_v53 = vpack.c.bf16 %v1286_v18, %v1286_v18 }
 0x402   : > { %v2199_v54 = vpop.eup %2198 }
 0x403   : > { %2048 = vmatmul.mubr.msk.bf16.vlgmr.msra.gmra.mxu1 %vm1059_vm3, %v1290_v53  ;;  %v1287_v55 = vmul.f32 %v2199_v54, %v2861_v11  ;;  %v2183_v54 = vld [vmem:[#allocation13] sm:$0xff]  }
 0x404   : > { %2061 = vmatprep.mubr.msk.bf16.mxu1 %vm2471_vm0, %v2470_v0  ;;  %2058 = vmatpush3.bf16.msra.mxu1 %v2182_v57 }
 0x405   : > { %v1291_v56 = vpack.c.bf16 %v1287_v55, %v1287_v55  ;;  %2059 = vmatprep.subr.bf16.mxu1 %v2470_v0 }
 0x407   : > { %2054 = vmatmul.mubr.msk.bf16.vlgmr.msra.gmra.mxu0 %vm1059_vm3, %v1291_v56 }
 0x408   : > { %2060 = vmatpush3.bf16.msra.mxu1 %v2183_v54 }
 0x4bb   : > { %v1337_v58 = vpop.f32.mrf.mxu1 }
 0x4bc   : > { %v1481_v2 = vpack.c.bf16 %v1337_v58, %v1337_v58 }
 0x4bd   : > { %v2037_v60 = vpop.f32.mrf.mxu1  ;;  %v1383_v61 = vpop.f32.mrf.mxu0 }
 0x4be   : > { %v1488_v7 = vrot.slane %v1481_v2, %v2774_v32  ;;  %v1515_v9 = vpack.c.bf16 %v1383_v61, %v1383_v61 }
 0x4bf   : > { %v1340_v59 = vpop.f32.mrf.mxu1  ;;  %v2043_v62 = vpop.f32.mrf.mxu0 }
 0x4c0   : > { %v1522_v17 = vrot.slane %v1515_v9, %v2774_v32 }
 0x4c1   : > { %v2038_v63 = vpop.f32.mrf.mxu1  ;;  %v1386_v1 = vpop.f32.mrf.mxu0 }
 0x4c3   : > { %v2044_v3 = vpop.f32.mrf.mxu0  ;;  %v1429_v4 = vpop.f32.mrf.mxu1 }
 0x4c4   : > { %v1489_v5 = vpack.c.bf16 %v1429_v4, %v1429_v4 }
 0x4c5   : > { %v2049_v6 = vpop.f32.mrf.mxu1 }
 0x4c6   : > { %v1496_v8 = vrot.slane %v1489_v5, %v2774_v32 }
 0x4c7   : > { %v1432_v10 = vpop.f32.mrf.mxu1  ;;  %v1475_v12 = vpop.f32.mrf.mxu0 }
 0x4c8   : > { %v1497_v11 = vcombine.low %v1488_v7, %v1496_v8  ;;  %v1498_v0 = vcombine.high %v1488_v7, %v1496_v8  ;;  %v1523_v13 = vpack.c.bf16 %v1475_v12, %v1475_v12 }
 0x4c9   : > { %v2050_v14 = vpop.f32.mrf.mxu1  ;;  %v2055_v16 = vpop.f32.mrf.mxu0 }
 0x4ca   : > { %v1505_v15 = vrot.slane %v1497_v11, %v2777_v36  ;;  %v1530_v19 = vrot.slane %v1523_v13, %v2774_v32  ;;  %v1512_v20 = vrot.slane %v1498_v0, %v2777_v36  ;;  %v1949_v0 = vld [vmem:[%s3032_s24] ss:$0 sm:$0xff] }
 0x4cb   : > { %v1478_v21 = vpop.f32.mrf.mxu0 }
 0x4cc   : > { %v1531_v22 = vcombine.low %v1522_v17, %v1530_v19  ;;  %v1532_v23 = vcombine.high %v1522_v17, %v1530_v19  ;;  %v1513_v24 = vcombine.high %v1505_v15, %v2477_v47  ;;  %v1514_v28 = vcombine.high %v1512_v20, %v2477_v47 }
 0x4cd   : > { %v2056_v25 = vpop.f32.mrf.mxu0  ;;  %v1553_v29 = vshrl.u32 %v1505_v15, 16  ;;  %v1569_v38 = vshrl.u32 %v1512_v20, 16 }
 0x4ce   : > { %v1539_v26 = vrot.slane %v1531_v22, %v2777_v36  ;;  %v1546_v27 = vrot.slane %v1532_v23, %v2777_v36  ;;  %v1561_v35 = vshrl.u32 %v1513_v24, 16  ;;  %v1577_v45 = vshrl.u32 %v1514_v28, 16 }
 0x4d0   : > { %v1547_v30 = vcombine.high %v1539_v26, %v2477_v47  ;;  %v1548_v31 = vcombine.high %v1546_v27, %v2477_v47  ;;  %v1551_v33 = vpack.i.b16 %v1539_v26, %v1505_v15  ;;  %v1554_v34 = vshrl.u32 %v1539_v26, 16 }
 0x4d1   : > { %v1567_v39 = vpack.i.b16 %v1546_v27, %v1512_v20  ;;  %v1570_v40 = vshrl.u32 %v1546_v27, 16 }
 0x4d2   : > { %v1555_v41 = vpack.i.b16 %v1554_v34, %v1553_v29  ;;  %v1559_v42 = vpack.i.b16 %v1547_v30, %v1513_v24  ;;  %v1562_v43 = vshrl.u32 %v1547_v30, 16  ;;  %v1575_v44 = vpack.i.b16 %v1548_v31, %v1514_v28 }
 0x4d3   : > { %v1571_v46 = vpack.i.b16 %v1570_v40, %v1569_v38  ;;  %v1578_v48 = vshrl.u32 %v1548_v31, 16  ;;  %v1581_v49 = vcombine.low %v1551_v33, %v1567_v39 }
 0x4d4   : > { %v1563_v50 = vpack.i.b16 %v1562_v43, %v1561_v35  ;;  %v1589_v51 = vcombine.low %v1559_v42, %v1575_v44 }
 0x4d5   : > { %v1579_v52 = vpack.i.b16 %v1578_v48, %v1577_v45  ;;  %v1606_v37 = vcombine.low %v1555_v41, %v1571_v46  ;;  %v1588_v18 = vrot.slane %v1581_v49, %v2774_v32 }
 0x4d6   : > { %v1596_v53 = vrot.slane %v1589_v51, %v2774_v32 }
 0x4d7   : > { %v1614_v55 = vcombine.low %v1563_v50, %v1579_v52  ;;  %v1613_v57 = vrot.slane %v1606_v37, %v2774_v32 }
 0x4d8   : > { %v1597_v56 = vcombine.low %v1588_v18, %v1596_v53 }
 0x4d9   : > { %v1621_v58 = vrot.slane %v1614_v55, %v2774_v32 }
 0x4da   : > { %v1604_v60 = vrot.slane %v1597_v56, %v2777_v36 }
 0x4db   : > { %v1622_v61 = vcombine.low %v1613_v57, %v1621_v58 }
 0x4dc   : > { %v1634_v62 = vshrl.u32 %v1604_v60, 16  ;;  %v1605_v1 = vcombine.high %v1604_v60, %v2477_v47 }
 0x4dd   : > { %v1629_v59 = vrot.slane %v1622_v61, %v2777_v36 }
 0x4de   : > { %v1640_v32 = vshrl.u32 %v1605_v1, 16 }
 0x4df   : > { %v1635_v63 = vshrl.u32 %v1629_v59, 16  ;;  %v1630_v2 = vcombine.high %v1629_v59, %v2477_v47  ;;  %v1633_v3 = vpack.i.b16 %v1629_v59, %v1604_v60 }
 0x4e1   : > { %v1636_v4 = vpack.i.b16 %v1635_v63, %v1634_v62  ;;  %v1639_v5 = vpack.i.b16 %v1630_v2, %v1605_v1  ;;  %v1641_v6 = vshrl.u32 %v1630_v2, 16 }
 0x4e3   : > { %1643 = vrot.lane.b32.xlu0 %v1636_v4, %s2478_s7  ;;  %1645 = vrot.lane.b32.xlu1 %v1639_v5, %s2479_s8  ;;  %v1642_v7 = vpack.i.b16 %v1641_v6, %v1640_v32 }
 0x4e7   : > { %1647 = vrot.lane.b32.xlu1 %v1642_v7, %s2480_s17 }
 0x555   : > { %v1644_v36 = vpop.permute.xlu0 %1643  ;;  %v1646_v8 = vpop.permute.xlu1 %1645 }
 0x556   : > { %v1651_v9 = vsel %vm1059_vm3, %v1633_v3, %v1644_v36 }
 0x557   : > { %v1654_v47 = vsel %vm1652_vm5, %v1651_v9, %v1646_v8 }
 0x559   : > { %v1648_v10 = vpop.permute.xlu1 %1647 }
 0x55a   : > { %v1657_v11 = vsel %vm1655_vm6, %v1654_v47, %v1648_v10 }
 0x55b   : > { %2062 = vmatmul.mubr.msk.bf16.vlgmr.msra.gmra.mxu1 %vm510_vm1, %v1657_v11 }
 0x61b   : > { %v1717_v12 = vpop.f32.mrf.mxu1 }
 0x61c   : > { %v1718_v13 = vadd.f32 %v1949_v0, %v1717_v12 }
 0x61d   : > { %v2063_v14 = vpop.f32.mrf.mxu1 }
 0x61e   : > { %1723 = vst.msk [vmem:[%s477_s22] sm:$0xff] %vm510_vm1, %v1718_v13 }
 0x61f   : > { %v1720_v15 = vpop.f32.mrf.mxu1 }
 0x620   : > { %2377 = shalt.err (!%p2374_p10)
}
 0x621   : > { %s2378_s14 = scalar_lea.hbm %s2927_s18, 128  ;;  %s2382_s7 = scalar_lea.hbm %s3033_s13, 256 }
 0x622   : > { %p2379_p13 = scmp.ne.s32.totalorder %s2927_s18, %s2378_s14  ;;  %p2383_p1 = scmp.lt.s32.totalorder %s2927_s18, %s3033_s13 }
 0x623   : > { %p2384_p4 = scmp.lt.s32.totalorder %s2382_s7, %s2378_s14 }
 0x624   : > { %p2380_p5 = pnand %p2379_p13, %p3034_p11 }
 0x625   : > { %p2385_p6 = por %p2384_p4, %p2383_p1 }
 0x626   : > { %p2381_p2 = pneg %p2380_p5 }
 0x628   : > { %p2386_p8 = pnand %p2385_p6, %p2381_p2 }
 0x62a   : > { %2389 = shalt.err (!%p2386_p8)
}
 0x62b   : > { %2081 = dma.vmem_to_hbm [thread:$0]  (%p3034_p11), %s2929_s21, 128, %s2927_s18, %s1725_s16   ;;  %v2064_v16 = vpop.f32.mrf.mxu1 }
 0x62c PF: > { %s3035_s20 = sld [smem:[#allocation22_spill]]  ;;  %p3038_p3 = scmp.ge.s32.totalorder %s2460_s10, 2 }
 0x62d   : > { %s3036_s27 = sld [smem:[#allocation24_spill]] }
 0x632   : > { %s1751_s15 = sand.u32 1, %s3035_s20  }
 0x633   : > { %p3037_p12 = scmp.ne.s32.totalorder %s3036_s27, 0  ;;  %s1752_s24 = scalar_lea.sflag [#allocation6], %s1751_s15 }
 0x635   : > { %p2104_p9 = pnand %p3038_p3, %p3037_p12 }
 0x637   : > { %p2105_p0 = pneg %p2104_p9 }
 0x639   : > { %2435 = dma.done.wait (%p2105_p0), %s1752_s24, 128  }
 0x63a   : > { %2437 = vsyncadd (%p2105_p0), %s1752_s24, 4294967168  ;;  %s31_s10 = sadd.s32 1, %s2460_s10   ;;  %s3039_s26 = sld [smem:[#allocation26_spill]] }
 0x63b   : > { %p28_p7 = scmp.ge.s32.totalorder %s31_s10, 4   ;;  %s3040_s30 = sld [smem:[#allocation23_spill]] }
 0x63c   : > { %s3041_s9 = sld [smem:[#allocation25_spill]]  ;;  %s3042_s27 = smov %s2444_s28 }
 0x63d   : > { %s3043_s28 = smov %s2448_s29  ;;  %30 = sbr.rel (!%p28_p7) target bundleno = 16 (0x10), region = 150 }
 0x640   : > { %s3044_s29 = smov %s3039_s26 }
 0x642   :  { %1757 = vsyncpa [#allocation5], 1 }
 0x643   :  { %1759 = vsyncpa [#allocation5 + $0x1], 1 }
 0x644   :  { %1760 = vsyncpa [#allocation8], 1 }
 0x645   :  { %1762 = vsyncpa [#allocation8 + $0x1], 1 }
 0x646   :  { %1763 = vsyncpa [#allocation11], 1 }
 0x647   :  { %1765 = vsyncpa [#allocation11 + $0x1], 1 }
 0x648   :  { %1766 = vsyncpa [#allocation14], 1 }
 0x649   :  { %1767 = vsyncpa [#allocation6], 1 }
 0x64a   :  { %1769 = vsyncpa [#allocation6 + $0x1], 1 }

// kernel: tpu_custom_call.1
= control target key start
LH: loop header
LB: loop body
LE: loop exit
PB: predicated region body
PF: predicated region fallthrough
CT: control target
= control target key end

     0   :  { %s2976_s0 = inlined_call_operand.hbm [shape: bf16[2,8,32], index: 0, kind: input, shape index: {}]   ;;  %s2977_s1 = inlined_call_operand.hbm [shape: bf16[2,8,32], index: 1, kind: input, shape index: {}]   ;;  %s2978_s2 = inlined_call_operand.hbm [shape: bf16[2,8,32], index: 2, kind: input, shape index: {}]   ;;  %s2979_s3 = inlined_call_operand.hbm [shape: bf16[2,1,8,8], index: 3, kind: input, shape index: {}]   ;;  %s2980_s4 = inlined_call_operand.hbm [shape: bf16[3,32,32], index: 4, kind: input, shape index: {}]   ;;  %s2981_s5 = inlined_call_operand.vmem [shape: f32[3,1,32], index: 5, kind: input, shape index: {}]   ;;  %s2982_s6 = inlined_call_operand.hbm [shape: bf16[32,32], index: 6, kind: input, shape index: {}]   ;;  %s2983_s7 = inlined_call_operand.vmem [shape: f32[1,32], index: 7, kind: input, shape index: {}]   ;;  %s2984_s8 = inlined_call_operand.hbm [shape: f32[2,8,32], index: 8, kind: output, shape index: {}]  }
   0x1   :  { %3000 = sst [smem:[#allocation27_spill]] %s2977_s1 }
   0x2   :  { %3001 = sst [smem:[#allocation28_spill]] %s2980_s4 }
   0x3   :  { %3002 = sst [smem:[#allocation29_spill]] %s2983_s7 }
   0x4   :  { %3003 = sst [smem:[#allocation30_spill]] %s2984_s8 }
   0x5   :  { %13 = vsyncpa [#allocation5], 0 }
   0x6   :  { %15 = vsyncpa [#allocation5 + $0x1], 0 }
   0x7   :  { %16 = vsyncpa [#allocation8], 0 }
   0x8   :  { %18 = vsyncpa [#allocation8 + $0x1], 0 }
   0x9   :  { %19 = vsyncpa [#allocation11], 0 }
   0xa   :  { %21 = vsyncpa [#allocation11 + $0x1], 0 }
   0xb   :  { %22 = vsyncpa [#allocation14], 0 }
   0xc   :  { %23 = vsyncpa [#allocation6], 0 }
   0xd   :  { %25 = vsyncpa [#allocation6 + $0x1], 0  ;;  %s2527_s27 = smov 0   ;;  %s2529_s28 = smov 0  }
   0xe   :  { %s2531_s29 = smov 0   ;;  %s2533_s30 = smov 0  }
   0xf   :  { %s2535_s9 = smov 0   ;;  %s2537_s10 = smov 0  }
  0x10 LB: > { %3004 = sst [smem:[#allocation22_spill]] %s2440_s27  ;;  %s2558_s11 = sadd.s32 4294967295, %s2460_s10   ;;  %s2460_s10 = sphi %s2537_s10, %s31_s10   ;;  %s2456_s9 = sphi %s2535_s9, %s3041_s9   ;;  %s2452_s30 = sphi %s2533_s30, %s3040_s30   ;;  %s2448_s29 = sphi %s2531_s29, %s3044_s29   ;;  %s2444_s28 = sphi %s2529_s28, %s3043_s28   ;;  %s2440_s27 = sphi %s2527_s27, %s3042_s27  }
  0x11   : > { %3005 = sst [smem:[#allocation23_spill]] %s2456_s9  ;;  %s1906_s12 = sadd.s32 4294967294, %s2460_s10  }
  0x12   : > { %p65_p0 = scmp.ne.s32.totalorder %s2444_s28, %s2440_s27  ;;  %p2992_p1 = scmp.eq.s32.totalorder %s2558_s11, 0 }
  0x13   : > { %p261_p3 = scmp.eq.s32.totalorder %s1906_s12, 1  ;;  %p1907_p5 = scmp.ge.s32.totalorder %s2460_s10, 1 }
  0x14   : > { %p2567_p4 = por %p2992_p1, %p65_p0  ;;  %p268_p7 = scmp.lt.s32.totalorder %s2460_s10, 3 }
  0x15   : > { %p2572_p6 = por %p261_p3, %p65_p0  ;;  %s2462_s16 = smov [#allocation12]  }
  0x16   : > { %s3006_s13 = scalar_select %p2567_p4, 1, 0 }
  0x17   : > { %s3007_s14 = scalar_select %p2572_p6, 1, 0 }
  0x18   : > { %p2577_p8 = pnand %p1907_p5, %p268_p7  ;;  %s280_s17 = sshll.u32 %s2462_s16, 4  ;;  %s281_s17 = int_to_ptr.vmem [resolvable:$true] %s280_s17 }
  0x19   : > { %3008 = sst [smem:[#allocation24_spill]] %s3007_s14  ;;  %s43_s19 = sadd.s32 1, %s2456_s9 }
  0x1a   : > { %s3009_s15 = scalar_select %p2577_p8, 1, 0 }
  0x1b   : > { %p2083_p9 = pneg %p2577_p8  ;;  %s2211_s20 = scalar_lea.vmem %s281_s17, 768 }
  0x1c   : > { %p2212_p13 = scmp.ne.s32.totalorder %s281_s17, %s2211_s20  ;;  %p2219_p5 = scmp.lt.s32.totalorder %s281_s17, %s281_s17 }
  0x1d   : > { %p2586_p11 = pnand %p2083_p9, %p2992_p1  ;;  %p2220_p7 = scmp.lt.s32.totalorder %s2211_s20, %s2211_s20 }
  0x1f   : > { %p2993_p12 = pneg %p2586_p11  ;;  %p2221_p2 = por %p2220_p7, %p2219_p5 }
  0x21   : > { %p2214_p0 = pnand %p2212_p13, %p2993_p12 }
  0x23   : > { %p2215_p3 = pneg %p2214_p0 }
  0x25   : > { %p2222_p10 = pnand %p2221_p2, %p2215_p3 }
  0x27   : > { %2225 = shalt.err (!%p2222_p10)
}
  0x28   : > { %s2985_s21 = smov 64   ;;  %s2986_s22 = smov 4  }
  0x29   : > { %s3011_s4 = sld [smem:[#allocation28_spill]]  ;;  %p45_p2 = scmp.ge.s32.totalorder %s43_s19, 2 }
  0x2a   : > { %s52_s25 = sadd.s32 1, %s2448_s29  ;;  %p59_p9 = scmp.ne.s32.totalorder %s2448_s29, %s2444_s28 }
  0x2b   : > { %p60_p10 = scmp.eq.s32.totalorder %s2460_s10, 0  ;;  %s3046_s19 = smov (%p45_p2, %s43_s19), 0 }
  0x2c   : > { %3012 = sst [smem:[#allocation25_spill]] %s3046_s19  ;;  %p3013_p0 = scmp.eq.s32.totalorder %s2558_s11, 1 }
  0x2d   : > { %p61_p13 = por %p60_p10, %p59_p9  ;;  %s47_s12 = ssub.s32 %s2456_s9, %s3046_s19 }
  0x2e   : > { %p2612_p3 = por %p3013_p0, %p59_p9  ;;  %p2109_p5 = scmp.lt.s32.totalorder %s2460_s10, 2 }
  0x2f   : > { %2086 = dma.hbm_to_vmem [thread:$0]  (!%p2586_p11), %s3011_s4, 768, %s281_s17, [#allocation11], %s2985_s21, %s2985_s21, %s2986_s22  }
  0x30   : > { %s3014_s26 = scalar_select %p2612_p3, 1, 0 }
  0x31   : > { %p50_p7 = scmp.eq.s32.totalorder %s47_s12, 0  ;;  %s2988_s16 = sand.u32 1, %s2448_s29  }
  0x32   : > { %s2622_s17 = sshll.u32 %s2988_s16, 2  ;;  %s2625_s20 = sshll.u32 %s2456_s9, 6 }
  0x33   : > { %s2628_s23 = scalar_select %p50_p7, %s2448_s29, %s52_s25  }
  0x34   : > { %p2630_p2 = pnand %p2109_p5, %p61_p13  ;;  %s2998_s21 = sand.u32 1, %s2460_s10  }
  0x35   : > { %3015 = sst [smem:[#allocation26_spill]] %s2628_s23  ;;  %s336_s19 = scalar_lea.vmem [#allocation7], %s2622_s17 }
  0x36   : > { %s3017_s1 = sld [smem:[#allocation27_spill]]  ;;  %s343_s16 = sshll.u32 %s336_s19, 4  ;;  %s344_s16 = int_to_ptr.vmem [resolvable:$true] %s343_s16 }
  0x37   : > { %s2642_s9 = scalar_lea.sflag [#allocation8], %s2998_s21  ;;  %p2994_p9 = pneg %p2630_p2 }
  0x38   : > { %s2239_s25 = scalar_lea.vmem %s344_s16, 64  ;;  %s2465_s23 = smov [#allocation7]  }
  0x39   : > { %p2240_p10 = scmp.ne.s32.totalorder %s344_s16, %s2239_s25  ;;  %s2244_s14 = sshll.u32 %s2465_s23, 4  ;;  %s2245_s14 = int_to_ptr.vmem [resolvable:$false] %s2244_s14 }
  0x3a   : > { %s2246_s27 = scalar_lea.vmem %s2245_s14, 128  ;;  %p2247_p5 = scmp.lt.s32.totalorder %s344_s16, %s2245_s14 }
  0x3b   : > { %p2242_p13 = pnand %p2240_p10, %p2994_p9  ;;  %p2248_p7 = scmp.lt.s32.totalorder %s2246_s27, %s2239_s25 }
  0x3c   : > { %s341_s12 = scalar_lea.hbm %s3017_s1, %s2625_s20 }
  0x3d   : > { %p2243_p0 = pneg %p2242_p13  ;;  %p2249_p1 = por %p2248_p7, %p2247_p5 }
  0x3f   : > { %p2250_p12 = pnand %p2249_p1, %p2243_p0 }
  0x41   : > { %2253 = shalt.err (!%p2250_p12)
}
  0x42   : > { %2096 = dma.hbm_to_vmem [thread:$0]  (!%p2630_p2), %s341_s12, 64, %s344_s16, %s2642_s9  }
  0x43   : > { %s2466_s4 = smov [#allocation13]   ;;  %p3018_p13 = pneg %p2586_p11 }
  0x44   : > { %s296_s19 = sshll.u32 %s2466_s4, 4  ;;  %s297_s19 = int_to_ptr.vmem [resolvable:$true] %s296_s19 }
  0x45   : > { %s2265_s22 = scalar_lea.vmem %s297_s19, 256  ;;  %p2273_p3 = scmp.lt.s32.totalorder %s297_s19, %s297_s19 }
  0x46   : > { %p2266_p10 = scmp.ne.s32.totalorder %s297_s19, %s2265_s22  ;;  %p2274_p4 = scmp.lt.s32.totalorder %s2265_s22, %s2265_s22 }
  0x48   : > { %p2268_p9 = pnand %p2266_p10, %p3018_p13  ;;  %p2275_p8 = por %p2274_p4, %p2273_p3 }
  0x4a   : > { %p2269_p6 = pneg %p2268_p9 }
  0x4c   : > { %p2276_p5 = pnand %p2275_p8, %p2269_p6 }
  0x4e   : > { %2279 = shalt.err (!%p2276_p5)
}
  0x4f   : > { %s3019_s27 = smov 4   ;;  %s3020_s14 = smov 64  }
  0x50   : > { %2089 = dma.hbm_to_vmem [thread:$0]  (!%p2586_p11), %s2982_s6, 256, %s297_s19, [#allocation14], %s3020_s14, %s3020_s14, %s3019_s27  }
  0x51   : > { %s323_s4 = scalar_lea.hbm %s2976_s0, %s2625_s20  ;;  %s317_s22 = scalar_lea.vmem [#allocation4], %s2622_s17 }
  0x52   : > { %s325_s21 = sshll.u32 %s317_s22, 4  ;;  %s3021_s1 = sand.u32 1, %s2448_s29   ;;  %s326_s21 = int_to_ptr.vmem [resolvable:$true] %s325_s21 }
  0x53   : > { %s314_s18 = scalar_lea.sflag [#allocation5], %s3021_s1  ;;  %s2293_s8 = scalar_lea.vmem %s326_s21, 64 }
  0x54   : > { %p2294_p1 = scmp.ne.s32.totalorder %s326_s21, %s2293_s8  ;;  %p3022_p4 = pneg %p2630_p2 }
  0x55   : > { %s2467_s16 = smov [#allocation4]  }
  0x56   : > { %p2296_p6 = pnand %p2294_p1, %p3022_p4  ;;  %s2298_s23 = sshll.u32 %s2467_s16, 4  ;;  %s2299_s23 = int_to_ptr.vmem [resolvable:$false] %s2298_s23 }
  0x57   : > { %s2300_s7 = scalar_lea.vmem %s2299_s23, 128  ;;  %p2301_p11 = scmp.lt.s32.totalorder %s326_s21, %s2299_s23 }
  0x58   : > { %p2297_p8 = pneg %p2296_p6  ;;  %p2302_p12 = scmp.lt.s32.totalorder %s2300_s7, %s2293_s8 }
  0x5a   : > { %p2303_p3 = por %p2302_p12, %p2301_p11 }
  0x5c   : > { %p2304_p9 = pnand %p2303_p3, %p2297_p8 }
  0x5e   : > { %2307 = shalt.err (!%p2304_p9)
}
  0x5f   : > { %2093 = dma.hbm_to_vmem [thread:$0]  (!%p2630_p2), %s323_s4, 64, %s326_s21, %s314_s18  }
  0x60   : > { %s359_s27 = scalar_lea.hbm %s2978_s2, %s2625_s20  ;;  %s354_s14 = scalar_lea.vmem [#allocation9], %s2622_s17 }
  0x61   : > { %s361_s12 = sshll.u32 %s354_s14, 4  ;;  %p3023_p7 = pmov %p3022_p4  ;;  %s362_s12 = int_to_ptr.vmem [resolvable:$true] %s361_s12 }
  0x62   : > { %s2321_s25 = scalar_lea.vmem %s362_s12, 64  ;;  %s2468_s7 = smov [#allocation9]  }
  0x63   : > { %p2322_p0 = scmp.ne.s32.totalorder %s362_s12, %s2321_s25  ;;  %s2326_s8 = sshll.u32 %s2468_s7, 4  ;;  %s2327_s8 = int_to_ptr.vmem [resolvable:$false] %s2326_s8 }
  0x64   : > { %s2328_s22 = scalar_lea.vmem %s2327_s8, 128  ;;  %p2329_p5 = scmp.lt.s32.totalorder %s362_s12, %s2327_s8 }
  0x65   : > { %p2324_p10 = pnand %p2322_p0, %p3023_p7  ;;  %p2330_p1 = scmp.lt.s32.totalorder %s2328_s22, %s2321_s25 }
  0x67   : > { %p2325_p13 = pneg %p2324_p10  ;;  %p2331_p4 = por %p2330_p1, %p2329_p5 }
  0x69   : > { %p2332_p6 = pnand %p2331_p4, %p2325_p13 }
  0x6b   : > { %2335 = shalt.err (!%p2332_p6)
}
  0x6c   : > { %2099 = dma.hbm_to_vmem [thread:$0]  (!%p2630_p2), %s359_s27, 64, %s362_s12, %s2642_s9  }
  0x6d   : > { %s378_s18 = scalar_lea.hbm %s2979_s3, %s2625_s20  ;;  %s372_s16 = scalar_lea.vmem [#allocation10], %s2622_s17 }
  0x6e   : > { %s380_s23 = sshll.u32 %s372_s16, 4  ;;  %s3024_s1 = sand.u32 1, %s2460_s10   ;;  %s381_s23 = int_to_ptr.vmem [resolvable:$true] %s380_s23 }
  0x6f   : > { %s369_s19 = scalar_lea.sflag [#allocation11], %s3024_s1  ;;  %s2349_s14 = scalar_lea.vmem %s381_s23, 64 }
  0x70   : > { %p2350_p8 = scmp.ne.s32.totalorder %s381_s23, %s2349_s14  ;;  %p3025_p11 = pmov %p3023_p7 }
  0x71   : > { %s2469_s25 = smov [#allocation10]  }
  0x72   : > { %p2352_p12 = pnand %p2350_p8, %p3025_p11  ;;  %s2354_s7 = sshll.u32 %s2469_s25, 4  ;;  %s2355_s7 = int_to_ptr.vmem [resolvable:$false] %s2354_s7 }
  0x73   : > { %s2356_s8 = scalar_lea.vmem %s2355_s7, 128  ;;  %p2357_p9 = scmp.lt.s32.totalorder %s381_s23, %s2355_s7 }
  0x74   : > { %p2353_p3 = pneg %p2352_p12  ;;  %p2358_p0 = scmp.lt.s32.totalorder %s2356_s8, %s2349_s14 }
  0x76   : > { %p2359_p7 = por %p2358_p0, %p2357_p9 }
  0x78   : > { %p2360_p10 = pnand %p2359_p7, %p2353_p3 }
  0x7a   : > { %2363 = shalt.err (!%p2360_p10)
}
  0x7b   : > { %2102 = dma.hbm_to_vmem [thread:$0]  (!%p2630_p2), %s378_s18, 64, %s381_s23, %s369_s19  }
  0x7c   : > { %p3026_p13 = scmp.ne.s32.totalorder %s3009_s15, 0 }
  0x7d   : > { %s2701_s9 = sand.u32 (!%p3026_p13), 1, %s2444_s28   ;;  %p3027_p5 = scmp.ne.s32.totalorder (!%p3026_p13), %s3006_s13, 0 }
  0x7e   : > { %389 = sbr.rel (%p3026_p13) target bundleno = 1580 (0x62c), region = 52  ;;  %s2704_s17 = sshll.u32 (!%p3026_p13), %s2701_s9, 2 }
  0x7f   : > { %s392_s20 = scalar_lea.sflag (!%p3026_p13), [#allocation5], %s2701_s9  ;;  %s395_s27 = scalar_lea.vmem (!%p3026_p13), [#allocation4], %s2704_s17 }
  0x83   : > { %2415 = dma.done.wait (%p3027_p5), %s392_s20, 64  }
  0x84   : > { %2417 = vsyncadd (%p3027_p5), %s392_s20, 4294967232  ;;  %s400_s15 = sand.u32 1, %s2558_s11   ;;  %s404_s12 = scalar_lea.vmem [#allocation7], %s2704_s17 }
  0x85   : > { %s401_s24 = scalar_lea.sflag [#allocation8], %s400_s15 }
  0x86   : > { %2419 = dma.done.wait (%p3027_p5), %s401_s24, 128  }
  0x87   : > { %2421 = vsyncadd (%p3027_p5), %s401_s24, 4294967168  ;;  %s413_s22 = scalar_lea.vmem [#allocation9], %s2704_s17  ;;  %s419_s21 = scalar_lea.sflag [#allocation11], %s400_s15 }
  0x88   : > { %s422_s4 = scalar_lea.vmem [#allocation10], %s2704_s17 }
  0x89   : > { %2423 = dma.done.wait (%p3027_p5), %s419_s21, 64  }
  0x8a   : > { %2425 = vsyncadd (%p3027_p5), %s419_s21, 4294967232  ;;  %p3028_p2 = scmp.eq.s32.totalorder %s2558_s11, 0 }
  0x8c   : > { %2427 = dma.done.wait (%p3028_p2), [#allocation11], 768   ;;  %p3029_p1 = pmov %p3028_p2 }
  0x8e   : > { %2429 = vsyncadd (%p3029_p1), [#allocation11], 4294966528  ;;  %p3030_p4 = pmov %p3029_p1 }
  0x8f   : > { %p3031_p6 = pmov %p3029_p1 }
  0x90   : > { %2431 = dma.done.wait (%p3030_p4), [#allocation14], 256  }
  0x91   : > { %2433 = vsyncadd (%p3031_p6), [#allocation14], 4294967040  ;;  %v2470_v0 = vmov 0.0   ;;  %vm2471_vm0 = vmmov 0   ;;  %v2176_v1 = vld [vmem:[#allocation12 + $0x18] sm:$0xff]   ;;  %v2177_v2 = vld [vmem:[#allocation12 + $0x10] sm:$0xff]   ;;  %v633_v26 = vlaneseq }
  0x92   : > { %1985 = vmatprep.subr.bf16.mxu0 %v2470_v0  ;;  %1989 = vmatprep.mubr.msk.bf16.mxu0 %vm2471_vm0, %v2470_v0  ;;  %v483_v3 = vld [vmem:[%s404_s12] sm:$0xf]  ;;  %vm510_vm1 = vcmask 261120   ;;  %v2179_v5 = vld [vmem:[#allocation12] sm:$0xff]   ;;  %s2472_s18 = smov 104   ;;  %s2473_s16 = smov 120  }
  0x93   : > { %1993 = vmatprep.subr.bf16.mxu1 %v2470_v0  ;;  %1997 = vmatprep.mubr.msk.bf16.mxu1 %vm2471_vm0, %v2470_v0  ;;  %v2178_v4 = vld [vmem:[#allocation12 + $0x8] sm:$0xff]   ;;  %v977_v6 = vld [vmem:[%s395_s27] sm:$0xf]  ;;  %s2474_s19 = smov 112   ;;  %v484_v23 = vld [vmem:[%s413_s22] sm:$0xf] }
  0x94   : > { %1986 = vmatpush3.bf16.msra.mxu0 %v2176_v1  ;;  %v1928_v7 = vld [vmem:[%s2981_s5 + $0x1] ss:$0 sm:$0xff]  ;;  %v1937_v14 = vld [vmem:[%s2981_s5] ss:$0 sm:$0xff]  ;;  %v2180_v20 = vld [vmem:[#allocation12 + $0x28] sm:$0xff]   ;;  %v634_v30 = vshrl.u32 %v633_v26, 7 }
  0x95   : > { %1987 = vmatprep.subr.bf16.mxu0 %v2470_v0  ;;  %1994 = vmatpush3.bf16.msra.mxu1 %v2180_v20  ;;  %v2181_v22 = vld [vmem:[#allocation12 + $0x20] sm:$0xff]   ;;  %v2475_v24 = vmov 1983009808   ;;  %v2476_v27 = vmov 1934713408   ;;  %v2477_v47 = vmov 0  }
  0x96   : > { %1995 = vmatprep.subr.bf16.mxu1 %v2470_v0  ;;  %v631_v25 = vunpack.c.l.s4 %v2475_v24  ;;  %v648_v28 = vunpack.c.l.s4 %v2476_v27  ;;  %vm902_vm2 = vcmask 60416   ;;  %vm1059_vm3 = vcmask 64512   ;;  %s2478_s7 = smov 8   ;;  %s2479_s8 = smov 16  }
  0x97   : > { %vm1299_vm4 = vcmask 1043456   ;;  %s2480_s17 = smov 24   ;;  %vm1652_vm5 = vcmask 130048   ;;  %vm1655_vm6 = vcmask 195584   ;;  %s1926_s20 = sshll.u32 %s2701_s9, 3 }
  0x98   : > { %1988 = vmatpush3.bf16.msra.mxu0 %v2177_v2  ;;  %v632_v29 = vunpack.c.0.s8 %v631_v25  ;;  %v649_v31 = vunpack.c.0.s8 %v648_v28  ;;  %s3032_s24 = sld [smem:[#allocation29_spill]]  ;;  %s1954_s12 = sshll.u32 %s2452_s30, 7 }
  0x99   : > { %2001 = vmatprep.subr.bf16.mxu0 %v2470_v0  ;;  %1996 = vmatpush3.bf16.msra.mxu1 %v2181_v22  ;;  %s477_s22 = scalar_lea.vmem [#allocation15], %s1926_s20  ;;  %s3033_s13 = sld [smem:[#allocation30_spill]] }
  0x9a   : > { %2009 = vmatprep.subr.bf16.mxu1 %v2470_v0  ;;  %v2774_v32 = vsub.s32 %v632_v29, %v634_v30  ;;  %v2777_v36 = vsub.s32 %v649_v31, %v634_v30  ;;  %s1739_s21 = sshll.u32 %s477_s22, 4  ;;  %p3034_p11 = scmp.ne.s32.totalorder %s3014_s26, 0  ;;  %s2929_s21 = int_to_ptr.vmem [resolvable:$true] %s1739_s21 }
  0x9b   : > { %1990 = vmatmul.mubr.msk.bf16.vlgmr.msra.gmra.mxu0 %vm510_vm1, %v483_v3  ;;  %s2364_s30 = scalar_lea.vmem %s2929_s21, 128  ;;  %s2481_s23 = smov [#allocation15]  }
  0x9c   : > { %2002 = vmatpush3.bf16.msra.mxu0 %v2178_v4  ;;  %2005 = vmatprep.mubr.msk.bf16.mxu0 %vm2471_vm0, %v2470_v0  ;;  %p2365_p8 = scmp.ne.s32.totalorder %s2929_s21, %s2364_s30  ;;  %s2368_s1 = sshll.u32 %s2481_s23, 4  ;;  %s2369_s1 = int_to_ptr.vmem [resolvable:$false] %s2368_s1 }
  0x9d   : > { %2003 = vmatprep.subr.bf16.mxu0 %v2470_v0  ;;  %1998 = vmatmul.mubr.msk.bf16.vlgmr.msra.gmra.mxu1 %vm510_vm1, %v484_v23  ;;  %p2371_p9 = scmp.lt.s32.totalorder %s2929_s21, %s2369_s1 }
  0x9e   : > { %2011 = vmatprep.mubr.msk.bf16.mxu1 %vm2471_vm0, %v2470_v0  ;;  %p2366_p12 = pnand %p2365_p8, %p3034_p11 }
  0xa0   : > { %2004 = vmatpush3.bf16.msra.mxu0 %v2179_v5  ;;  %p2367_p3 = pneg %p2366_p12 }
  0xa1   : > { %2015 = vmatprep.subr.bf16.mxu0 %v2470_v0 }
  0xa3   : > { %2006 = vmatmul.mubr.msk.bf16.vlgmr.msra.gmra.mxu0 %vm510_vm1, %v977_v6 }
  0xa4   : > { %2017 = vmatprep.mubr.msk.bf16.mxu0 %vm2471_vm0, %v2470_v0 }
 0x15b   : > { %v548_v8 = vpop.f32.mrf.mxu0 }
 0x15c   : > { %v549_v9 = vadd.f32 %v1928_v7, %v548_v8 }
 0x15d   : > { %v1991_v10 = vpop.f32.mrf.mxu0 }
 0x15e   : > { %v622_v11 = vpack.c.bf16 %v549_v9, %v549_v9 }
 0x15f   : > { %v551_v12 = vpop.f32.mrf.mxu0 }
 0x160   : > { %628 = vrot.lane.b32.xlu1 %v622_v11, %s2472_s18  ;;  %624 = vrot.lane.b32.xlu0 %v622_v11, %s2473_s16  ;;  %v636_v43 = vrot.slane %v622_v11, %v2774_v32 }
 0x161   : > { %v1992_v13 = vpop.f32.mrf.mxu0 }
 0x163   : > { %v1039_v15 = vpop.f32.mrf.mxu0 }
 0x164   : > { %626 = vrot.lane.b32.xlu0 %v622_v11, %s2474_s19  ;;  %v1040_v16 = vadd.f32 %v1937_v14, %v1039_v15 }
 0x165   : > { %v2007_v17 = vpop.f32.mrf.mxu0 }
 0x166   : > { %v2759_v18 = vpack.c.bf16 %v1040_v16, %v1040_v16 }
 0x167   : > { %v1042_v19 = vpop.f32.mrf.mxu0 }
 0x168   : > { %1047 = vrot.lane.b32.xlu1 %v2759_v18, %s2473_s16  ;;  %1049 = vrot.lane.b32.xlu0 %v2759_v18, %s2474_s19 }
 0x169   : > { %v2008_v21 = vpop.f32.mrf.mxu0 }
 0x16c   : > { %1051 = vrot.lane.b32.xlu1 %v2759_v18, %s2472_s18 }
 0x1d2   : > { %v629_v33 = vpop.permute.xlu1 %628  ;;  %v625_v34 = vpop.permute.xlu0 %624 }
 0x1d3   : > { %v678_v35 = vrot.slane %v629_v33, %v2774_v32  ;;  %v670_v37 = vrot.slane %v625_v34, %v2774_v32 }
 0x1d5   : > { %v679_v38 = vcombine.low %v670_v37, %v678_v35  ;;  %v680_v39 = vcombine.high %v670_v37, %v678_v35 }
 0x1d6   : > { %v627_v40 = vpop.permute.xlu0 %626 }
 0x1d7   : > { %v687_v41 = vrot.slane %v679_v38, %v2777_v36  ;;  %v644_v42 = vrot.slane %v627_v40, %v2774_v32  ;;  %v694_v44 = vrot.slane %v680_v39, %v2777_v36 }
 0x1d9   : > { %v645_v45 = vcombine.low %v636_v43, %v644_v42  ;;  %v646_v46 = vcombine.high %v636_v43, %v644_v42  ;;  %v695_v48 = vcombine.high %v687_v41, %v2477_v47  ;;  %v696_v51 = vcombine.high %v694_v44, %v2477_v47  ;;  %v616_v42 = vpop.f32.mrf.mxu1 }
 0x1da   : > { %v702_v52 = vshrl.u32 %v687_v41, 16  ;;  %v718_v58 = vshrl.u32 %v694_v44, 16  ;;  %v1048_v39 = vpop.permute.xlu1 %1047 }
 0x1db   : > { %v653_v49 = vrot.slane %v645_v45, %v2777_v36  ;;  %v660_v50 = vrot.slane %v646_v46, %v2777_v36  ;;  %v710_v57 = vshrl.u32 %v695_v48, 16  ;;  %v726_v2 = vshrl.u32 %v696_v51, 16  ;;  %v1999_v43 = vpop.f32.mrf.mxu1  ;;  %v1057_v46 = vld [vmem:[%s422_s4] sm:$0xf] }
 0x1dd   : > { %v661_v53 = vcombine.high %v653_v49, %v2477_v47  ;;  %v662_v54 = vcombine.high %v660_v50, %v2477_v47  ;;  %v699_v55 = vpack.i.b16 %v687_v41, %v653_v49  ;;  %v701_v56 = vshrl.u32 %v653_v49, 16 }
 0x1de   : > { %v715_v59 = vpack.i.b16 %v694_v44, %v660_v50  ;;  %v717_v60 = vshrl.u32 %v660_v50, 16  ;;  %v1052_v41 = vpop.permute.xlu1 %1051  ;;  %v619_v44 = vpop.f32.mrf.mxu1 }
 0x1df   : > { %v703_v61 = vpack.i.b16 %v702_v52, %v701_v56  ;;  %v707_v62 = vpack.i.b16 %v695_v48, %v661_v53  ;;  %v709_v63 = vshrl.u32 %v661_v53, 16  ;;  %v723_v1 = vpack.i.b16 %v696_v51, %v662_v54 }
 0x1e0   : > { %v719_v3 = vpack.i.b16 %v718_v58, %v717_v60  ;;  %v725_v4 = vshrl.u32 %v662_v54, 16  ;;  %v836_v5 = vcombine.low %v699_v55, %v715_v59  ;;  %v2000_v45 = vpop.f32.mrf.mxu1  ;;  %v1058_v48 = vunpack.c.l.bf16 %v1057_v46 }
 0x1e1   : > { %v711_v6 = vpack.i.b16 %v710_v57, %v709_v63  ;;  %v844_v7 = vcombine.low %v707_v62, %v723_v1 }
 0x1e2   : > { %v727_v8 = vpack.i.b16 %v726_v2, %v725_v4  ;;  %v861_v9 = vcombine.low %v703_v61, %v719_v3  ;;  %v843_v10 = vrot.slane %v836_v5, %v2774_v32 }
 0x1e3   : > { %v851_v11 = vrot.slane %v844_v7, %v2774_v32 }
 0x1e4   : > { %v869_v12 = vcombine.low %v711_v6, %v727_v8  ;;  %v868_v14 = vrot.slane %v861_v9, %v2774_v32  ;;  %v1933_v6 = vld [vmem:[%s2981_s5 + $0x2] ss:$0 sm:$0xff] }
 0x1e5   : > { %v852_v13 = vcombine.low %v843_v10, %v851_v11  ;;  %v617_v11 = vadd.f32 %v1933_v6, %v616_v42 }
 0x1e6   : > { %v876_v15 = vrot.slane %v869_v12, %v2774_v32 }
 0x1e7   : > { %v859_v16 = vrot.slane %v852_v13, %v2777_v36  ;;  %v729_v12 = vpack.c.bf16 %v617_v11, %v617_v11 }
 0x1e8   : > { %v877_v17 = vcombine.low %v868_v14, %v876_v15 }
 0x1e9   : > { %v860_v19 = vcombine.high %v859_v16, %v2477_v47  ;;  %v890_v23 = vshrl.u32 %v859_v16, 16 }
 0x1ea   : > { %v884_v20 = vrot.slane %v877_v17, %v2777_v36 }
 0x1eb   : > { %v898_v27 = vshrl.u32 %v860_v19, 16 }
 0x1ec   : > { %v885_v21 = vcombine.high %v884_v20, %v2477_v47  ;;  %v888_v22 = vpack.i.b16 %v884_v20, %v859_v16  ;;  %v891_v24 = vshrl.u32 %v884_v20, 16 }
 0x1ee   : > { %v892_v25 = vpack.i.b16 %v891_v24, %v890_v23  ;;  %v896_v26 = vpack.i.b16 %v885_v21, %v860_v19  ;;  %v899_v28 = vshrl.u32 %v885_v21, 16  ;;  %903 = vst.msk [vmem:[#allocation2] sm:$0xf] %vm902_vm2, %v888_v22 }
 0x1f0   : > { %v900_v29 = vpack.i.b16 %v899_v28, %v898_v27  ;;  %904 = vst.msk [vmem:[#allocation2 + $0x4] sm:$0xf] %vm902_vm2, %v892_v25  ;;  %905 = vst.msk [vmem:[#allocation2 + $0x8] sm:$0xf] %vm902_vm2, %v896_v26 }
 0x1f2   : > { %906 = vst.msk [vmem:[#allocation2 + $0xc] sm:$0xf] %vm902_vm2, %v900_v29 }
 0x1f5   : > { %v1053_v30 = vld [vmem:[#allocation2] sm:$0xf] }
 0x1f6   : > { %v1064_v31 = vsel %vm1059_vm3, %v1053_v30, 0 }
 0x1f7   : > { %2010 = vmatpush3.bf16.xpose.msra.mxu1 %v1064_v31  ;;  %v1054_v33 = vld [vmem:[#allocation2 + $0x4] sm:$0xf]  ;;  %v1055_v35 = vld [vmem:[#allocation2 + $0x8] sm:$0xf] }
 0x1f8   : > { %v1110_v34 = vsel %vm1059_vm3, %v1054_v33, 0  ;;  %2021 = vmatprep.subr.bf16.mxu1 %v2470_v0  ;;  %v1156_v38 = vsel %vm1059_vm3, %v1055_v35, 0 }
 0x1f9   : > { %2016 = vmatpush3.bf16.xpose.msra.mxu0 %v1110_v34  ;;  %v1056_v37 = vld [vmem:[#allocation2 + $0xc] sm:$0xf] }
 0x1fa   : > { %2027 = vmatprep.subr.bf16.mxu0 %v2470_v0  ;;  %v1202_v40 = vsel %vm1059_vm3, %v1056_v37, 0 }
 0x1fe   : > { %2012 = vmatmul.mubr.msk.bf16.vlgmr.msra.gmra.mxu1 %vm1059_vm3, %v2759_v18  ;;  %v1050_v18 = vpop.permute.xlu0 %1049 }
 0x1ff   : > { %2022 = vmatpush3.bf16.xpose.msra.mxu1 %v1156_v38  ;;  %2023 = vmatprep.mubr.msk.bf16.mxu1 %vm2471_vm0, %v2470_v0  ;;  %v743_v38 = vrot.slane %v729_v12, %v2774_v32 }
 0x200   : > { %2018 = vmatmul.mubr.msk.bf16.vlgmr.msra.gmra.mxu0 %vm1059_vm3, %v1048_v39  ;;  %2033 = vmatprep.subr.bf16.mxu1 %v2470_v0 }
 0x201   : > { %2028 = vmatpush3.bf16.xpose.msra.mxu0 %v1202_v40  ;;  %2029 = vmatprep.mubr.msk.bf16.mxu0 %vm2471_vm0, %v2470_v0 }
 0x202   : > { %2039 = vmatprep.subr.bf16.mxu0 %v2470_v0 }
 0x206   : > { %2024 = vmatmul.mubr.msk.bf16.vlgmr.msra.gmra.mxu1 %vm1059_vm3, %v1050_v18 }
 0x207   : > { %2035 = vmatprep.mubr.msk.bf16.mxu1 %vm2471_vm0, %v2470_v0 }
 0x208   : > { %2030 = vmatmul.mubr.msk.bf16.vlgmr.msra.gmra.mxu0 %vm1059_vm3, %v1052_v41 }
 0x209   : > { %2041 = vmatprep.mubr.msk.bf16.mxu0 %vm2471_vm0, %v2470_v0 }
 0x2be   : > { %v1100_v49 = vpop.f32.mrf.mxu1 }
 0x2bf   : > { %v1101_v50 = vadd.f32 %v1100_v49, %v1058_v48 }
 0x2c0   : > { %v2013_v51 = vpop.f32.mrf.mxu1  ;;  %v1146_v52 = vpop.f32.mrf.mxu0 }
 0x2c1   : > { %v1147_v53 = vadd.f32 %v1146_v52, %v1058_v48  ;;  %v1244_v54 = vsel %vm1059_vm3, %v1101_v50, -inf }
 0x2c2   : > { %1245 = vmax.xlane.f32.xlu0 %v1244_v54  ;;  %v1103_v55 = vpop.f32.mrf.mxu1  ;;  %v2019_v56 = vpop.f32.mrf.mxu0 }
 0x2c3   : > { %v1247_v57 = vsel %vm1059_vm3, %v1147_v53, -inf }
 0x2c4   : > { %v2014_v58 = vpop.f32.mrf.mxu1  ;;  %1248 = vmax.xlane.f32.xlu1 %v1247_v57  ;;  %v1149_v59 = vpop.f32.mrf.mxu0 }
 0x2c6   : > { %v2020_v60 = vpop.f32.mrf.mxu0  ;;  %v1192_v61 = vpop.f32.mrf.mxu1 }
 0x2c7   : > { %v1193_v62 = vadd.f32 %v1192_v61, %v1058_v48 }
 0x2c8   : > { %v2025_v63 = vpop.f32.mrf.mxu1  ;;  %v1238_v1 = vpop.f32.mrf.mxu0 }
 0x2c9   : > { %v1239_v2 = vadd.f32 %v1238_v1, %v1058_v48  ;;  %v1250_v3 = vsel %vm1059_vm3, %v1193_v62, -inf }
 0x2ca   : > { %1251 = vmax.xlane.f32.xlu0 %v1250_v3  ;;  %v1195_v4 = vpop.f32.mrf.mxu1  ;;  %v2031_v5 = vpop.f32.mrf.mxu0 }
 0x2cb   : > { %v1253_v9 = vsel %vm1059_vm3, %v1239_v2, -inf }
 0x2cc   : > { %v2026_v7 = vpop.f32.mrf.mxu1  ;;  %v1241_v8 = vpop.f32.mrf.mxu0 }
 0x2ce   : > { %1254 = vmax.xlane.f32.xlu0 %v1253_v9  ;;  %v2032_v10 = vpop.f32.mrf.mxu0 }
 0x2d5   : > { %731 = vrot.lane.b32.xlu1 %v729_v12, %s2473_s16  ;;  %s1725_s16 = scalar_lea.sflag [#allocation6], %s2701_s9 }
 0x2d9   : > { %735 = vrot.lane.b32.xlu1 %v729_v12, %s2472_s18  ;;  %s2927_s18 = scalar_lea.hbm %s3033_s13, %s1954_s12 }
 0x2e4   : > { %733 = vrot.lane.b32.xlu0 %v729_v12, %s2474_s19  ;;  %s2370_s19 = scalar_lea.vmem %s2369_s1, 256 }
 0x2e5   : > { %p2372_p0 = scmp.lt.s32.totalorder %s2370_s19, %s2364_s30 }
 0x2e7   : > { %p2373_p7 = por %p2372_p0, %p2371_p9 }
 0x2e9   : > { %p2374_p10 = pnand %p2373_p7, %p2367_p3 }
 0x34b   : > { %v1246_v13 = vpop.xlane.xlu0 %1245 }
 0x34c   : > { %v1256_v14 = vsub.f32 %v1101_v50, %v1246_v13 }
 0x34d   : > { %v1249_v15 = vpop.xlane.xlu1 %1248 }
 0x34e   : > { %v1260_v16 = vmul.f32 1.442695, %v1256_v14  ;;  %v1257_v17 = vsub.f32 %v1147_v53, %v1249_v15 }
 0x350   : > { %2184 = vpow2.f32 %v1260_v16  ;;  %v1262_v19 = vmul.f32 1.442695, %v1257_v17 }
 0x351   : > { %v732_v20 = vpop.permute.xlu1 %731 }
 0x352   : > { %2186 = vpow2.f32 %v1262_v19  ;;  %v777_v24 = vrot.slane %v732_v20, %v2774_v32 }
 0x353   : > { %v1252_v21 = vpop.xlane.xlu0 %1251 }
 0x354   : > { %v1258_v22 = vsub.f32 %v1193_v62, %v1252_v21 }
 0x355   : > { %v736_v23 = vpop.permute.xlu1 %735 }
 0x356   : > { %v1264_v25 = vmul.f32 1.442695, %v1258_v22  ;;  %v785_v26 = vrot.slane %v736_v23, %v2774_v32 }
 0x357   : > { %v1255_v27 = vpop.xlane.xlu0 %1254 }
 0x358   : > { %2188 = vpow2.f32 %v1264_v25  ;;  %v786_v28 = vcombine.low %v777_v24, %v785_v26  ;;  %v787_v29 = vcombine.high %v777_v24, %v785_v26  ;;  %v1259_v30 = vsub.f32 %v1239_v2, %v1255_v27 }
 0x35a   : > { %v1266_v31 = vmul.f32 1.442695, %v1259_v30  ;;  %v794_v34 = vrot.slane %v786_v28, %v2777_v36  ;;  %v801_v35 = vrot.slane %v787_v29, %v2777_v36 }
 0x35b   : > { %v734_v33 = vpop.permute.xlu0 %733 }
 0x35c   : > { %2190 = vpow2.f32 %v1266_v31  ;;  %v751_v39 = vrot.slane %v734_v33, %v2774_v32  ;;  %v802_v43 = vcombine.high %v794_v34, %v2477_v47  ;;  %v803_v44 = vcombine.high %v801_v35, %v2477_v47 }
 0x35d   : > { %v2839_v37 = vpop.eup %2184  ;;  %v809_v49 = vshrl.u32 %v794_v34, 16  ;;  %v825_v50 = vshrl.u32 %v801_v35, 16 }
 0x35e   : > { %v1268_v40 = vsel %vm1059_vm3, %v2839_v37, 0.0  ;;  %v752_v41 = vcombine.low %v743_v38, %v751_v39  ;;  %v753_v42 = vcombine.high %v743_v38, %v751_v39  ;;  %v817_v55 = vshrl.u32 %v802_v43, 16 }
 0x35f   : > { %v2845_v18 = vpop.eup %2186  ;;  %1269 = vadd.xlane.f32.xlu1 %v1268_v40  ;;  %v833_v56 = vshrl.u32 %v803_v44, 16 }
 0x360   : > { %v1271_v45 = vsel %vm1059_vm3, %v2845_v18, 0.0  ;;  %v760_v46 = vrot.slane %v752_v41, %v2777_v36  ;;  %v767_v48 = vrot.slane %v753_v42, %v2777_v36 }
 0x361   : > { %1272 = vadd.xlane.f32.xlu0 %v1271_v45 }
 0x362   : > { %v768_v51 = vcombine.high %v760_v46, %v2477_v47  ;;  %v769_v52 = vcombine.high %v767_v48, %v2477_v47  ;;  %v806_v53 = vpack.i.b16 %v794_v34, %v760_v46  ;;  %v808_v54 = vshrl.u32 %v760_v46, 16 }
 0x363   : > { %v822_v57 = vpack.i.b16 %v801_v35, %v767_v48  ;;  %v824_v58 = vshrl.u32 %v767_v48, 16 }
 0x364   : > { %v810_v60 = vpack.i.b16 %v809_v49, %v808_v54  ;;  %v814_v61 = vpack.i.b16 %v802_v43, %v768_v51  ;;  %v816_v62 = vshrl.u32 %v768_v51, 16  ;;  %v830_v63 = vpack.i.b16 %v803_v44, %v769_v52 }
 0x365   : > { %v2855_v59 = vpop.eup %2188  ;;  %v826_v1 = vpack.i.b16 %v825_v50, %v824_v58  ;;  %v832_v2 = vshrl.u32 %v769_v52, 16  ;;  %v907_v3 = vcombine.low %v806_v53, %v822_v57  ;;  %v2182_v57 = vld [vmem:[#allocation13 + $0x8] sm:$0xff]  }
 0x366   : > { %v1274_v4 = vsel %vm1059_vm3, %v2855_v59, 0.0  ;;  %v818_v5 = vpack.i.b16 %v817_v55, %v816_v62  ;;  %v915_v6 = vcombine.low %v814_v61, %v830_v63 }
 0x367   : > { %1275 = vadd.xlane.f32.xlu0 %v1274_v4  ;;  %v834_v7 = vpack.i.b16 %v833_v56, %v832_v2  ;;  %v932_v8 = vcombine.low %v810_v60, %v826_v1  ;;  %v914_v9 = vrot.slane %v907_v3, %v2774_v32 }
 0x368   : > { %v922_v10 = vrot.slane %v915_v6, %v2774_v32 }
 0x369   : > { %v2861_v11 = vpop.eup %2190  ;;  %v940_v12 = vcombine.low %v818_v5, %v834_v7  ;;  %v939_v15 = vrot.slane %v932_v8, %v2774_v32 }
 0x36a   : > { %v923_v13 = vcombine.low %v914_v9, %v922_v10  ;;  %v1277_v14 = vsel %vm1059_vm3, %v2861_v11, 0.0 }
 0x36b   : > { %v947_v16 = vrot.slane %v940_v12, %v2774_v32  ;;  %1278 = vadd.xlane.f32.xlu1 %v1277_v14 }
 0x36c   : > { %v930_v17 = vrot.slane %v923_v13, %v2777_v36 }
 0x36d   : > { %v948_v19 = vcombine.low %v939_v15, %v947_v16 }
 0x36e   : > { %v931_v20 = vcombine.high %v930_v17, %v2477_v47  ;;  %v961_v24 = vshrl.u32 %v930_v17, 16 }
 0x36f   : > { %v955_v21 = vrot.slane %v948_v19, %v2777_v36 }
 0x370   : > { %v969_v28 = vshrl.u32 %v931_v20, 16 }
 0x371   : > { %v956_v22 = vcombine.high %v955_v21, %v2477_v47  ;;  %v959_v23 = vpack.i.b16 %v955_v21, %v930_v17  ;;  %v962_v25 = vshrl.u32 %v955_v21, 16 }
 0x373   : > { %v963_v26 = vpack.i.b16 %v962_v25, %v961_v24  ;;  %v967_v27 = vpack.i.b16 %v956_v22, %v931_v20  ;;  %v970_v29 = vshrl.u32 %v956_v22, 16  ;;  %973 = vst.msk [vmem:[#allocation3] sm:$0xf] %vm902_vm2, %v959_v23 }
 0x375   : > { %v971_v30 = vpack.i.b16 %v970_v29, %v969_v28  ;;  %974 = vst.msk [vmem:[#allocation3 + $0x4] sm:$0xf] %vm902_vm2, %v963_v26  ;;  %975 = vst.msk [vmem:[#allocation3 + $0x8] sm:$0xf] %vm902_vm2, %v967_v27 }
 0x377   : > { %976 = vst.msk [vmem:[#allocation3 + $0xc] sm:$0xf] %vm902_vm2, %v971_v30 }
 0x37a   : > { %v1292_v31 = vld [vmem:[#allocation3] sm:$0xf] }
 0x37b   : > { %v1301_v33 = vsel %vm1299_vm4, %v1292_v31, 0 }
 0x37c   : > { %2034 = vmatpush3.bf16.msra.mxu1 %v1301_v33  ;;  %v1293_v34 = vld [vmem:[#allocation3 + $0x4] sm:$0xf]  ;;  %v1294_v45 = vld [vmem:[#allocation3 + $0x8] sm:$0xf] }
 0x37d   : > { %v1347_v35 = vsel %vm1299_vm4, %v1293_v34, 0  ;;  %2045 = vmatprep.subr.bf16.mxu1 %v2470_v0  ;;  %v1393_v50 = vsel %vm1299_vm4, %v1294_v45, 0 }
 0x37e   : > { %2040 = vmatpush3.bf16.msra.mxu0 %v1347_v35  ;;  %v1295_v49 = vld [vmem:[#allocation3 + $0xc] sm:$0xf] }
 0x37f   : > { %2051 = vmatprep.subr.bf16.mxu0 %v2470_v0  ;;  %v1439_v52 = vsel %vm1299_vm4, %v1295_v49, 0 }
 0x3e8   : > { %v1270_v38 = vpop.xlane.xlu1 %1269 }
 0x3e9   : > { %2192 = vrcp.f32 %v1270_v38 }
 0x3ea   : > { %v1273_v39 = vpop.xlane.xlu0 %1272 }
 0x3eb   : > { %2194 = vrcp.f32 %v1273_v39 }
 0x3f0   : > { %v1276_v40 = vpop.xlane.xlu0 %1275 }
 0x3f1   : > { %2196 = vrcp.f32 %v1276_v40 }
 0x3f4   : > { %v1279_v41 = vpop.xlane.xlu1 %1278 }
 0x3f5   : > { %2198 = vrcp.f32 %v1279_v41 }
 0x3f6   : > { %v2193_v42 = vpop.eup %2192 }
 0x3f7   : > { %v1284_v43 = vmul.f32 %v2193_v42, %v2839_v37 }
 0x3f8   : > { %v2195_v44 = vpop.eup %2194 }
 0x3f9   : > { %v1288_v46 = vpack.c.bf16 %v1284_v43, %v1284_v43  ;;  %v1285_v48 = vmul.f32 %v2195_v44, %v2845_v18 }
 0x3fb   : > { %2036 = vmatmul.mubr.msk.bf16.vlgmr.msra.gmra.mxu1 %vm1059_vm3, %v1288_v46  ;;  %v1289_v51 = vpack.c.bf16 %v1285_v48, %v1285_v48 }
 0x3fc   : > { %2046 = vmatpush3.bf16.msra.mxu1 %v1393_v50  ;;  %2047 = vmatprep.mubr.msk.bf16.mxu1 %vm2471_vm0, %v2470_v0 }
 0x3fd   : > { %2042 = vmatmul.mubr.msk.bf16.vlgmr.msra.gmra.mxu0 %vm1059_vm3, %v1289_v51  ;;  %2057 = vmatprep.subr.bf16.mxu1 %v2470_v0 }
 0x3fe   : > { %v2197_v37 = vpop.eup %2196  ;;  %2052 = vmatpush3.bf16.msra.mxu0 %v1439_v52  ;;  %2053 = vmatprep.mubr.msk.bf16.mxu0 %vm2471_vm0, %v2470_v0 }
 0x3ff   : > { %v1286_v18 = vmul.f32 %v2197_v37, %v2855_v59 }
 0x401   : > { %v1290_v53 = vpack.c.bf16 %v1286_v18, %v1286_v18 }
 0x402   : > { %v2199_v54 = vpop.eup %2198 }
 0x403   : > { %2048 = vmatmul.mubr.msk.bf16.vlgmr.msra.gmra.mxu1 %vm1059_vm3, %v1290_v53  ;;  %v1287_v55 = vmul.f32 %v2199_v54, %v2861_v11  ;;  %v2183_v54 = vld [vmem:[#allocation13] sm:$0xff]  }
 0x404   : > { %2061 = vmatprep.mubr.msk.bf16.mxu1 %vm2471_vm0, %v2470_v0  ;;  %2058 = vmatpush3.bf16.msra.mxu1 %v2182_v57 }
 0x405   : > { %v1291_v56 = vpack.c.bf16 %v1287_v55, %v1287_v55  ;;  %2059 = vmatprep.subr.bf16.mxu1 %v2470_v0 }
 0x407   : > { %2054 = vmatmul.mubr.msk.bf16.vlgmr.msra.gmra.mxu0 %vm1059_vm3, %v1291_v56 }
 0x408   : > { %2060 = vmatpush3.bf16.msra.mxu1 %v2183_v54 }
 0x4bb   : > { %v1337_v58 = vpop.f32.mrf.mxu1 }
 0x4bc   : > { %v1481_v2 = vpack.c.bf16 %v1337_v58, %v1337_v58 }
 0x4bd   : > { %v2037_v60 = vpop.f32.mrf.mxu1  ;;  %v1383_v61 = vpop.f32.mrf.mxu0 }
 0x4be   : > { %v1488_v7 = vrot.slane %v1481_v2, %v2774_v32  ;;  %v1515_v9 = vpack.c.bf16 %v1383_v61, %v1383_v61 }
 0x4bf   : > { %v1340_v59 = vpop.f32.mrf.mxu1  ;;  %v2043_v62 = vpop.f32.mrf.mxu0 }
 0x4c0   : > { %v1522_v17 = vrot.slane %v1515_v9, %v2774_v32 }
 0x4c1   : > { %v2038_v63 = vpop.f32.mrf.mxu1  ;;  %v1386_v1 = vpop.f32.mrf.mxu0 }
 0x4c3   : > { %v2044_v3 = vpop.f32.mrf.mxu0  ;;  %v1429_v4 = vpop.f32.mrf.mxu1 }
 0x4c4   : > { %v1489_v5 = vpack.c.bf16 %v1429_v4, %v1429_v4 }
 0x4c5   : > { %v2049_v6 = vpop.f32.mrf.mxu1 }
 0x4c6   : > { %v1496_v8 = vrot.slane %v1489_v5, %v2774_v32 }
 0x4c7   : > { %v1432_v10 = vpop.f32.mrf.mxu1  ;;  %v1475_v12 = vpop.f32.mrf.mxu0 }
 0x4c8   : > { %v1497_v11 = vcombine.low %v1488_v7, %v1496_v8  ;;  %v1498_v0 = vcombine.high %v1488_v7, %v1496_v8  ;;  %v1523_v13 = vpack.c.bf16 %v1475_v12, %v1475_v12 }
 0x4c9   : > { %v2050_v14 = vpop.f32.mrf.mxu1  ;;  %v2055_v16 = vpop.f32.mrf.mxu0 }
 0x4ca   : > { %v1505_v15 = vrot.slane %v1497_v11, %v2777_v36  ;;  %v1530_v19 = vrot.slane %v1523_v13, %v2774_v32  ;;  %v1512_v20 = vrot.slane %v1498_v0, %v2777_v36  ;;  %v1949_v0 = vld [vmem:[%s3032_s24] ss:$0 sm:$0xff] }
 0x4cb   : > { %v1478_v21 = vpop.f32.mrf.mxu0 }
 0x4cc   : > { %v1531_v22 = vcombine.low %v1522_v17, %v1530_v19  ;;  %v1532_v23 = vcombine.high %v1522_v17, %v1530_v19  ;;  %v1513_v24 = vcombine.high %v1505_v15, %v2477_v47  ;;  %v1514_v28 = vcombine.high %v1512_v20, %v2477_v47 }
 0x4cd   : > { %v2056_v25 = vpop.f32.mrf.mxu0  ;;  %v1553_v29 = vshrl.u32 %v1505_v15, 16  ;;  %v1569_v38 = vshrl.u32 %v1512_v20, 16 }
 0x4ce   : > { %v1539_v26 = vrot.slane %v1531_v22, %v2777_v36  ;;  %v1546_v27 = vrot.slane %v1532_v23, %v2777_v36  ;;  %v1561_v35 = vshrl.u32 %v1513_v24, 16  ;;  %v1577_v45 = vshrl.u32 %v1514_v28, 16 }
 0x4d0   : > { %v1547_v30 = vcombine.high %v1539_v26, %v2477_v47  ;;  %v1548_v31 = vcombine.high %v1546_v27, %v2477_v47  ;;  %v1551_v33 = vpack.i.b16 %v1539_v26, %v1505_v15  ;;  %v1554_v34 = vshrl.u32 %v1539_v26, 16 }
 0x4d1   : > { %v1567_v39 = vpack.i.b16 %v1546_v27, %v1512_v20  ;;  %v1570_v40 = vshrl.u32 %v1546_v27, 16 }
 0x4d2   : > { %v1555_v41 = vpack.i.b16 %v1554_v34, %v1553_v29  ;;  %v1559_v42 = vpack.i.b16 %v1547_v30, %v1513_v24  ;;  %v1562_v43 = vshrl.u32 %v1547_v30, 16  ;;  %v1575_v44 = vpack.i.b16 %v1548_v31, %v1514_v28 }
 0x4d3   : > { %v1571_v46 = vpack.i.b16 %v1570_v40, %v1569_v38  ;;  %v1578_v48 = vshrl.u32 %v1548_v31, 16  ;;  %v1581_v49 = vcombine.low %v1551_v33, %v1567_v39 }
 0x4d4   : > { %v1563_v50 = vpack.i.b16 %v1562_v43, %v1561_v35  ;;  %v1589_v51 = vcombine.low %v1559_v42, %v1575_v44 }
 0x4d5   : > { %v1579_v52 = vpack.i.b16 %v1578_v48, %v1577_v45  ;;  %v1606_v37 = vcombine.low %v1555_v41, %v1571_v46  ;;  %v1588_v18 = vrot.slane %v1581_v49, %v2774_v32 }
 0x4d6   : > { %v1596_v53 = vrot.slane %v1589_v51, %v2774_v32 }
 0x4d7   : > { %v1614_v55 = vcombine.low %v1563_v50, %v1579_v52  ;;  %v1613_v57 = vrot.slane %v1606_v37, %v2774_v32 }
 0x4d8   : > { %v1597_v56 = vcombine.low %v1588_v18, %v1596_v53 }
 0x4d9   : > { %v1621_v58 = vrot.slane %v1614_v55, %v2774_v32 }
 0x4da   : > { %v1604_v60 = vrot.slane %v1597_v56, %v2777_v36 }
 0x4db   : > { %v1622_v61 = vcombine.low %v1613_v57, %v1621_v58 }
 0x4dc   : > { %v1634_v62 = vshrl.u32 %v1604_v60, 16  ;;  %v1605_v1 = vcombine.high %v1604_v60, %v2477_v47 }
 0x4dd   : > { %v1629_v59 = vrot.slane %v1622_v61, %v2777_v36 }
 0x4de   : > { %v1640_v32 = vshrl.u32 %v1605_v1, 16 }
 0x4df   : > { %v1635_v63 = vshrl.u32 %v1629_v59, 16  ;;  %v1630_v2 = vcombine.high %v1629_v59, %v2477_v47  ;;  %v1633_v3 = vpack.i.b16 %v1629_v59, %v1604_v60 }
 0x4e1   : > { %v1636_v4 = vpack.i.b16 %v1635_v63, %v1634_v62  ;;  %v1639_v5 = vpack.i.b16 %v1630_v2, %v1605_v1  ;;  %v1641_v6 = vshrl.u32 %v1630_v2, 16 }
 0x4e3   : > { %1643 = vrot.lane.b32.xlu0 %v1636_v4, %s2478_s7  ;;  %1645 = vrot.lane.b32.xlu1 %v1639_v5, %s2479_s8  ;;  %v1642_v7 = vpack.i.b16 %v1641_v6, %v1640_v32 }
 0x4e7   : > { %1647 = vrot.lane.b32.xlu1 %v1642_v7, %s2480_s17 }
 0x555   : > { %v1644_v36 = vpop.permute.xlu0 %1643  ;;  %v1646_v8 = vpop.permute.xlu1 %1645 }
 0x556   : > { %v1651_v9 = vsel %vm1059_vm3, %v1633_v3, %v1644_v36 }
 0x557   : > { %v1654_v47 = vsel %vm1652_vm5, %v1651_v9, %v1646_v8 }
 0x559   : > { %v1648_v10 = vpop.permute.xlu1 %1647 }
 0x55a   : > { %v1657_v11 = vsel %vm1655_vm6, %v1654_v47, %v1648_v10 }
 0x55b   : > { %2062 = vmatmul.mubr.msk.bf16.vlgmr.msra.gmra.mxu1 %vm510_vm1, %v1657_v11 }
 0x61b   : > { %v1717_v12 = vpop.f32.mrf.mxu1 }
 0x61c   : > { %v1718_v13 = vadd.f32 %v1949_v0, %v1717_v12 }
 0x61d   : > { %v2063_v14 = vpop.f32.mrf.mxu1 }
 0x61e   : > { %1723 = vst.msk [vmem:[%s477_s22] sm:$0xff] %vm510_vm1, %v1718_v13 }
 0x61f   : > { %v1720_v15 = vpop.f32.mrf.mxu1 }
 0x620   : > { %2377 = shalt.err (!%p2374_p10)
}
 0x621   : > { %s2378_s14 = scalar_lea.hbm %s2927_s18, 128  ;;  %s2382_s7 = scalar_lea.hbm %s3033_s13, 256 }
 0x622   : > { %p2379_p13 = scmp.ne.s32.totalorder %s2927_s18, %s2378_s14  ;;  %p2383_p1 = scmp.lt.s32.totalorder %s2927_s18, %s3033_s13 }
 0x623   : > { %p2384_p4 = scmp.lt.s32.totalorder %s2382_s7, %s2378_s14 }
 0x624   : > { %p2380_p5 = pnand %p2379_p13, %p3034_p11 }
 0x625   : > { %p2385_p6 = por %p2384_p4, %p2383_p1 }
 0x626   : > { %p2381_p2 = pneg %p2380_p5 }
 0x628   : > { %p2386_p8 = pnand %p2385_p6, %p2381_p2 }
 0x62a   : > { %2389 = shalt.err (!%p2386_p8)
}
 0x62b   : > { %2081 = dma.vmem_to_hbm [thread:$0]  (%p3034_p11), %s2929_s21, 128, %s2927_s18, %s1725_s16   ;;  %v2064_v16 = vpop.f32.mrf.mxu1 }
 0x62c PF: > { %s3035_s20 = sld [smem:[#allocation22_spill]]  ;;  %p3038_p3 = scmp.ge.s32.totalorder %s2460_s10, 2 }
 0x62d   : > { %s3036_s27 = sld [smem:[#allocation24_spill]] }
 0x632   : > { %s1751_s15 = sand.u32 1, %s3035_s20  }
 0x633   : > { %p3037_p12 = scmp.ne.s32.totalorder %s3036_s27, 0  ;;  %s1752_s24 = scalar_lea.sflag [#allocation6], %s1751_s15 }
 0x635   : > { %p2104_p9 = pnand %p3038_p3, %p3037_p12 }
 0x637   : > { %p2105_p0 = pneg %p2104_p9 }
 0x639   : > { %2435 = dma.done.wait (%p2105_p0), %s1752_s24, 128  }
 0x63a   : > { %2437 = vsyncadd (%p2105_p0), %s1752_s24, 4294967168  ;;  %s31_s10 = sadd.s32 1, %s2460_s10   ;;  %s3039_s26 = sld [smem:[#allocation26_spill]] }
 0x63b   : > { %p28_p7 = scmp.ge.s32.totalorder %s31_s10, 4   ;;  %s3040_s30 = sld [smem:[#allocation23_spill]] }
 0x63c   : > { %s3041_s9 = sld [smem:[#allocation25_spill]]  ;;  %s3042_s27 = smov %s2444_s28 }
 0x63d   : > { %s3043_s28 = smov %s2448_s29  ;;  %30 = sbr.rel (!%p28_p7) target bundleno = 16 (0x10), region = 150 }
 0x640   : > { %s3044_s29 = smov %s3039_s26 }
 0x642   :  { %1757 = vsyncpa [#allocation5], 1 }
 0x643   :  { %1759 = vsyncpa [#allocation5 + $0x1], 1 }
 0x644   :  { %1760 = vsyncpa [#allocation8], 1 }
 0x645   :  { %1762 = vsyncpa [#allocation8 + $0x1], 1 }
 0x646   :  { %1763 = vsyncpa [#allocation11], 1 }
 0x647   :  { %1765 = vsyncpa [#allocation11 + $0x1], 1 }
 0x648   :  { %1766 = vsyncpa [#allocation14], 1 }
 0x649   :  { %1767 = vsyncpa [#allocation6], 1 }
 0x64a   :  { %1769 = vsyncpa [#allocation6 + $0x1], 1 }

</bundles_post_ra>
